<compile_context>
chip_gen: v7x
topology: tpu7x:2x2x1
jax: 0.10.0
libtpu: 0.0.40
codegen_flags: <defaults>
</compile_context>

<pallas_src>
import math

import jax
import jax.numpy as jnp
from jax.experimental import pallas as pl
from jax.experimental.pallas import tpu as pltpu

# ---------------- model dimensions (synthetic, deterministic) ----------------
F_N = 32       # node feature width (same for every node type, for simplicity)
F_E = 16       # edge feature width
F_G = 8        # global feature width
F_E_OUT = 16   # updated edge feature width
F_N_OUT = 32   # updated node feature width
F_G_OUT = 8    # updated global feature width

LANE = 128     # all kernel outputs padded to 128 feature columns (lane-dense stores)
SUB = 8        # all row counts padded to multiples of 8 (aligned sublanes)


# ------------------------------ small helpers --------------------------------
def _round_up(x, m):
    return ((x + m - 1) // m) * m


def _pad_rows(x, rows, fill=0):
    r = x.shape[0]
    if rows == r:
        return x
    pad = jnp.full((rows - r,) + x.shape[1:], fill, dtype=x.dtype)
    return jnp.concatenate([x, pad], axis=0)


def _pad_cols(x, cols, fill=0):
    c = x.shape[1]
    if cols == c:
        return x
    pad = jnp.full((x.shape[0], cols - c), fill, dtype=x.dtype)
    return jnp.concatenate([x, pad], axis=1)


def _full_spec(shape):
    nd = len(shape)
    return pl.BlockSpec(shape, lambda *_: (0,) * nd)


# --------------------- one-time parameter preparation -------------------------
def prepare_params(params, edge_types, node_types, node_feat_dims, edge_feat_dims, f_g):
    """Pads / splits all weights once, OUTSIDE the jitted forward (hoisted glue)."""
    pp = {"edge": [], "node": [], "global": None}
    for e, (src_t, _rel, dst_t) in enumerate(edge_types):
        W, b = params["edge"][e]
        fs = node_feat_dims[node_types.index(src_t)]
        fd = node_feat_dims[node_types.index(dst_t)]
        fe = edge_feat_dims[e]
        o = 0
        w_src = _pad_cols(W[o:o + fs], LANE); o += fs
        w_dst = _pad_cols(W[o:o + fd], LANE); o += fd
        w_e = _pad_cols(W[o:o + fe], LANE); o += fe
        w_u = _pad_cols(W[o:o + f_g], LANE)
        b_p = _pad_cols(b.reshape(1, -1), LANE)
        pp["edge"].append((w_src, w_dst, w_e, w_u, b_p))
    for ni in range(len(node_types)):
        W, b = params["node"][ni]
        fn = node_feat_dims[ni]
        f_agg = W.shape[0] - fn - f_g
        w_agg = _pad_cols(_pad_rows(W[:f_agg], LANE), LANE)       # agg lives in 128-wide space
        w_x = _pad_cols(W[f_agg:f_agg + fn], LANE)
        w_u = _pad_cols(W[f_agg + fn:], LANE)
        b_p = _pad_cols(b.reshape(1, -1), LANE)
        pp["node"].append((w_agg, w_x, w_u, b_p))
    Wg, bg = params["global"]
    off = 0
    wg_nodes = []
    for ni in range(len(node_types)):
        f_out = params["node"][ni][1].shape[0]
        wg_nodes.append(_pad_cols(_pad_rows(Wg[off:off + f_out], LANE), LANE))
        off += f_out
    w_g = _pad_cols(Wg[off:], LANE)
    bg_p = _pad_cols(bg.reshape(1, -1), LANE)
    pp["global"] = (wg_nodes, w_g, bg_p)
    return pp


# --------------------------- fused Pallas kernel ------------------------------
N_EDGE_REFS = 10   # row, col, col_row, gid, ef, w_src, w_dst, w_e, w_u, b
N_NODE_REFS = 9    # bid_col, bid_row, inv_cnt, x, w_agg, w_x, w_u, b, wg_node


def _make_fused_kernel(node_types, edge_types):
    """edge stage -> node stage -> global stage, all in one kernel body.

    Intermediates are written to (and read back from) their VMEM output refs, so nothing
    round-trips HBM between stages.
    """
    n_nt = len(node_types)
    n_et = len(edge_types)
    src_of = [node_types.index(s) for (s, _r, _d) in edge_types]
    dst_of = [node_types.index(d) for (_s, _r, d) in edge_types]

    def kernel(*refs):
        f32 = jnp.float32
        it = iter(refs)
        u_ref = next(it)
        edge_in = [tuple(next(it) for _ in range(N_EDGE_REFS)) for _ in range(n_et)]
        node_in = [tuple(next(it) for _ in range(N_NODE_REFS)) for _ in range(n_nt)]
        wg_ref = next(it)
        bg_ref = next(it)
        e_out = [next(it) for _ in range(n_et)]
        n_out = [next(it) for _ in range(n_nt)]
        g_out = next(it)

        u = u_ref[...]                                    # (Gp, F_g)
        Gp = u.shape[0]

        # ----------------------------- edge stage -----------------------------
        for e in range(n_et):
            (row_ref, col_ref, _colrow_ref, gid_ref, ef_ref,
             ws_ref, wd_ref, we_ref, wu_ref, b_ref) = edge_in[e]
            xs_ref = node_in[src_of[e]][3]
            xd_ref = node_in[dst_of[e]][3]
            Ep = e_out[e].shape[0]
            Ns = xs_ref.shape[0]
            Nd = xd_ref.shape[0]

            row = row_ref[...]                            # (Ep, 1), padded rows = -1
            col = col_ref[...]
            gid = gid_ref[...]

            sel_s = (row == jax.lax.broadcasted_iota(jnp.int32, (Ep, Ns), 1)).astype(f32)
            sel_d = (col == jax.lax.broadcasted_iota(jnp.int32, (Ep, Nd), 1)).astype(f32)
            sel_g = (gid == jax.lax.broadcasted_iota(jnp.int32, (Ep, Gp), 1)).astype(f32)

            x_s = jnp.dot(sel_s, xs_ref[...], preferred_element_type=f32)  # gather src
            x_d = jnp.dot(sel_d, xd_ref[...], preferred_element_type=f32)  # gather dst
            u_e = jnp.dot(sel_g, u, preferred_element_type=f32)            # gather globals

            # concat([x_s, x_d, e, u]) @ W == sum of split-W matmuls, one f32 accumulator.
            y = jnp.dot(x_s, ws_ref[...], preferred_element_type=f32)
            y = y + jnp.dot(x_d, wd_ref[...], preferred_element_type=f32)
            y = y + jnp.dot(ef_ref[...], we_ref[...], preferred_element_type=f32)
            y = y + jnp.dot(u_e, wu_ref[...], preferred_element_type=f32)
            y = y + b_ref[...]
            valid = (row >= 0).astype(f32)                # zero padded rows explicitly
            e_out[e][...] = jnp.maximum(y, 0.0) * valid

        # ----------------------------- node stage -----------------------------
        for ni in range(n_nt):
            (bid_ref, _bidrow_ref, _inv_ref, x_ref,
             wa_ref, wx_ref, wun_ref, bn_ref, _wgn_ref) = node_in[ni]
            Np = n_out[ni].shape[0]

            y = jnp.dot(x_ref[...], wx_ref[...], preferred_element_type=f32)

            # scatter-sum of incoming edge messages (read back from VMEM output refs)
            agg = None
            for e in range(n_et):
                if dst_of[e] != ni:
                    continue
                colrow = edge_in[e][2][...]               # (1, Ep_e), padded entries = -1
                eo = e_out[e][...]                        # (Ep_e, 128)
                Ep = eo.shape[0]
                sel = (colrow ==
                       jax.lax.broadcasted_iota(jnp.int32, (Np, Ep), 0)).astype(f32)
                msg = jnp.dot(sel, eo, preferred_element_type=f32)
                agg = msg if agg is None else agg + msg
            if agg is not None:
                y = y + jnp.dot(agg, wa_ref[...], preferred_element_type=f32)

            bid = bid_ref[...]                            # (Np, 1), padded rows = -1
            sel_b = (bid ==
                     jax.lax.broadcasted_iota(jnp.int32, (Np, Gp), 1)).astype(f32)
            u_n = jnp.dot(sel_b, u, preferred_element_type=f32)  # gather globals
            y = y + jnp.dot(u_n, wun_ref[...], preferred_element_type=f32)
            y = y + bn_ref[...]
            valid = (bid >= 0).astype(f32)                # zero padded rows explicitly
            n_out[ni][...] = jnp.maximum(y, 0.0) * valid

        # ---------------------------- global stage ----------------------------
        yg = jnp.dot(u, wg_ref[...], preferred_element_type=f32)
        for ni in range(n_nt):
            (_bid_ref, bidrow_ref, inv_ref, _x_ref,
             _wa, _wx, _wun, _bn, wgn_ref) = node_in[ni]
            xn = n_out[ni][...]                           # read back from VMEM output ref
            Np = xn.shape[0]
            bidrow = bidrow_ref[...]                      # (1, Np), padded entries = -1
            sel = (bidrow ==
                   jax.lax.broadcasted_iota(jnp.int32, (Gp, Np), 0)).astype(f32)
            # scatter-mean: in-kernel sum, precomputed 1/count (structural, passed in)
            pooled = jnp.dot(sel, xn, preferred_element_type=f32) * inv_ref[...]
            yg = yg + jnp.dot(pooled, wgn_ref[...], preferred_element_type=f32)
        yg = yg + bg_ref[...]
        g_out[...] = jnp.maximum(yg, 0.0)

    return kernel


# ------------------------------ fused forward pass ----------------------------
def hetero_meta_layer(padded_params, edge_features, edge_indices, edge_types,
                      node_features, node_types, global_features, batches, out_dims):
    """HeteroMetaLayer forward: edge model -> node model -> global model, one fused kernel."""
    n_nt = len(node_types)
    n_et = len(edge_types)
    F_g = global_features.shape[0]
    G = global_features.shape[1]

    # ---- padded, lane/sublane-aligned layouts shared across the three stages
    Gp = _round_up(G, SUB)
    u_t = _pad_rows(global_features.T, Gp)                            # (Gp, F_g)

    Np = [_round_up(x.shape[0], SUB) for x in node_features]
    x_pad = [_pad_rows(node_features[i], Np[i]) for i in range(n_nt)]
    bid_col = [_pad_rows(batches[i].astype(jnp.int32).reshape(-1, 1), Np[i], fill=-1)
               for i in range(n_nt)]                                  # (Np_i, 1)
    bid_row = [b.reshape(1, -1) for b in bid_col]                     # (1, Np_i)

    # precomputed per-graph inverse node counts (structural; no in-kernel reduce needed)
    inv_cnt = []
    for i in range(n_nt):
        cnt = jax.ops.segment_sum(jnp.ones((node_features[i].shape[0],), jnp.float32),
                                  batches[i], num_segments=Gp)
        inv_cnt.append((1.0 / jnp.maximum(cnt, 1.0)).reshape(Gp, 1))

    Ep = [_round_up(ef.shape[0], SUB) for ef in edge_features]

    # ---- flat input list (ordering must match _make_fused_kernel's unpack)
    inputs = [u_t]
    flops = 0
    for e, (src_t, _rel, dst_t) in enumerate(edge_types):
        si = node_types.index(src_t)
        di = node_types.index(dst_t)
        row = edge_indices[e][0].astype(jnp.int32)
        col = edge_indices[e][1].astype(jnp.int32)
        gid = jnp.take(batches[di].astype(jnp.int32), col)            # graph of dst node

        row_p = _pad_rows(row.reshape(-1, 1), Ep[e], fill=-1)
        col_p = _pad_rows(col.reshape(-1, 1), Ep[e], fill=-1)
        gid_p = _pad_rows(gid.reshape(-1, 1), Ep[e], fill=-1)
        ef_p = _pad_rows(edge_features[e], Ep[e])

        w_src, w_dst, w_e, w_u, b_p = padded_params["edge"][e]
        inputs += [row_p, col_p, col_p.reshape(1, -1), gid_p, ef_p,
                   w_src, w_dst, w_e, w_u, b_p]

        fs = node_features[si].shape[1]
        fd = node_features[di].shape[1]
        fe = edge_features[e].shape[1]
        flops += 2 * Ep[e] * (Np[si] * fs + Np[di] * fd + Gp * F_g)
        flops += 2 * Ep[e] * LANE * (fs + fd + fe + F_g)

    wg_nodes, w_g, bg_p = padded_params["global"]
    for ni in range(n_nt):
        w_agg, w_x, w_u, b_p = padded_params["node"][ni]
        inputs += [bid_col[ni], bid_row[ni], inv_cnt[ni], x_pad[ni],
                   w_agg, w_x, w_u, b_p, wg_nodes[ni]]
        fn = node_features[ni].shape[1]
        flops += 2 * Np[ni] * LANE * (LANE + fn + F_g) + 2 * Np[ni] * Gp * F_g
        for e in range(n_et):
            if node_types.index(edge_types[e][2]) == ni:
                flops += 2 * Np[ni] * Ep[e] * LANE
        flops += 2 * Gp * Np[ni] * LANE + 2 * Gp * LANE * LANE
    inputs += [w_g, bg_p]
    flops += 2 * Gp * F_g * LANE

    out_shapes = ([jax.ShapeDtypeStruct((Ep[e], LANE), jnp.float32) for e in range(n_et)]
                  + [jax.ShapeDtypeStruct((Np[i], LANE), jnp.float32) for i in range(n_nt)]
                  + [jax.ShapeDtypeStruct((Gp, LANE), jnp.float32)])

    nbytes = sum(a.size * jnp.dtype(a.dtype).itemsize for a in inputs)
    nbytes += sum(math.prod(s.shape) * jnp.dtype(s.dtype).itemsize for s in out_shapes)

    outs = pl.pallas_call(
        _make_fused_kernel(node_types, edge_types),
        out_shape=tuple(out_shapes),
        grid=(1,),
        in_specs=[_full_spec(a.shape) for a in inputs],
        out_specs=tuple(_full_spec(s.shape) for s in out_shapes),
        compiler_params=pltpu.CompilerParams(
            dimension_semantics=("arbitrary",),
            vmem_limit_bytes=32 << 20),           # tiny working set; explicit, v7x-safe
        cost_estimate=pl.CostEstimate(flops=int(flops), transcendentals=0,
                                      bytes_accessed=int(nbytes)),
    )(*inputs)

    e_pad = outs[:n_et]
    n_pad = outs[n_et:n_et + n_nt]
    g_pad = outs[n_et + n_nt]

    # ------------------------ slice back to API shapes -------------------------
    new_edge = [e_pad[e][:edge_features[e].shape[0], :out_dims["edge"][e]]
                for e in range(n_et)]
    new_node = [n_pad[i][:node_features[i].shape[0], :out_dims["node"][i]]
                for i in range(n_nt)]
    new_global = g_pad[:G, :out_dims["global"]].T                     # (F_G_OUT, num_graphs)
    return new_edge, new_node, new_global


# ------------------------------ pure-JAX reference ----------------------------
def _ref_forward(params, edge_features, edge_indices, edge_types,
                 node_features, node_types, global_features, batches):
    def lin_relu(x, w, b):
        return jnp.maximum(x @ w + b, 0.0)

    def seg(messages, ids, n, mean=False):
        s = jax.ops.segment_sum(messages, ids, num_segments=n)
        if mean:
            c = jnp.maximum(jax.ops.segment_sum(jnp.ones((messages.shape[0],)), ids,
                                                num_segments=n), 1.0)
            s = s / c[:, None]
        return s

    u_t = global_features.T
    new_e = []
    for e, (src_t, _r, dst_t) in enumerate(edge_types):
        si, di = node_types.index(src_t), node_types.index(dst_t)
        row, col = edge_indices[e][0], edge_indices[e][1]
        inp = jnp.concatenate([node_features[si][row], node_features[di][col],
                               edge_features[e], u_t[batches[di][col]]], axis=-1)
        W, b = params["edge"][e]
        new_e.append(lin_relu(inp, W, b))
    new_n = []
    for ni, nt in enumerate(node_types):
        N = node_features[ni].shape[0]
        agg = jnp.zeros((N, F_E_OUT))
        for e, (_s, _r, dst_t) in enumerate(edge_types):
            if dst_t == nt:
                agg = agg + seg(new_e[e], edge_indices[e][1], N)
        inp = jnp.concatenate([agg, node_features[ni], u_t[batches[ni]]], axis=-1)
        W, b = params["node"][ni]
        new_n.append(lin_relu(inp, W, b))
    B = global_features.shape[1]
    pooled = [seg(new_n[ni], batches[ni], B, mean=True) for ni in range(len(node_types))]
    inp = jnp.concatenate(pooled + [global_features.T], axis=-1)
    W, b = params["global"]
    return new_e, new_n, lin_relu(inp, W, b).T


# ----------------------------------- main -------------------------------------
if __name__ == "__main__":
    key = jax.random.PRNGKey(0)

    node_types = ["agent", "obj"]
    edge_types = [("agent", "interacts", "obj"),
                  ("obj", "near", "agent"),
                  ("agent", "sees", "obj")]
    num_nodes = {"agent": 6, "obj": 10}
    num_edges = [12, 14, 9]
    num_graphs = 2

    keys = jax.random.split(key, 32)
    ki = iter(range(32))

    node_features = [jax.random.normal(keys[next(ki)], (num_nodes[t], F_N), jnp.float32)
                     for t in node_types]
    batches = [jnp.array([0, 0, 0, 1, 1, 1], jnp.int32),
               jnp.array([0, 0, 0, 0, 0, 1, 1, 1, 1, 1], jnp.int32)]

    edge_features = [jax.random.normal(keys[next(ki)], (E, F_E), jnp.float32)
                     for E in num_edges]
    edge_indices = []
    for e, (src_t, _r, dst_t) in enumerate(edge_types):
        row = jax.random.randint(keys[next(ki)], (num_edges[e],), 0, num_nodes[src_t])
        col = jax.random.randint(keys[next(ki)], (num_edges[e],), 0, num_nodes[dst_t])
        edge_indices.append(jnp.stack([row, col]).astype(jnp.int32))

    # global features, shape (num_global_features, num_graphs) per module docstring
    global_features = jax.random.normal(keys[next(ki)], (F_G, num_graphs), jnp.float32)

    def init_lin(k, din, dout):
        kw, kb = jax.random.split(k)
        return (0.1 * jax.random.normal(kw, (din, dout), jnp.float32),
                0.1 * jax.random.normal(kb, (dout,), jnp.float32))

    params = {
        "edge": [init_lin(keys[next(ki)], 2 * F_N + F_E + F_G, F_E_OUT)
                 for _ in edge_types],
        "node": [init_lin(keys[next(ki)], F_E_OUT + F_N + F_G, F_N_OUT)
                 for _ in node_types],
        "global": init_lin(keys[next(ki)], len(node_types) * F_N_OUT + F_G, F_G_OUT),
    }

    # one-time weight padding / splitting, hoisted OUT of the jitted forward
    padded_params = prepare_params(
        params, edge_types, node_types,
        node_feat_dims=[F_N] * len(node_types),
        edge_feat_dims=[F_E] * len(edge_types), f_g=F_G)
    out_dims = {"edge": [F_E_OUT] * len(edge_types),
                "node": [F_N_OUT] * len(node_types),
                "global": F_G_OUT}

    # jit the whole forward (one fused kernel + tiny padding/index glue); type lists static.
    fwd = jax.jit(lambda pp, ef, ei, nf, gf, bt: hetero_meta_layer(
        pp, ef, ei, edge_types, nf, node_types, gf, bt, out_dims))

    out_e, out_n, out_g = fwd(padded_params, edge_features, edge_indices,
                              node_features, global_features, batches)
    jax.block_until_ready(out_g)

    ref_e, ref_n, ref_g = _ref_forward(
        params, edge_features, edge_indices, edge_types,
        node_features, node_types, global_features, batches)

    for a, b in zip(out_e, ref_e):
        assert jnp.allclose(a, b, atol=1e-4, rtol=1e-4)
    for a, b in zip(out_n, ref_n):
        assert jnp.allclose(a, b, atol=1e-4, rtol=1e-4)
    assert jnp.allclose(out_g, ref_g, atol=1e-4, rtol=1e-4)

    print("KERNEL_OK")
</pallas_src>

<mosaic_0001>
module attributes {stable_mosaic.version = 11 : i64} {
  func.func @kernel(%arg0: i32, %arg1: memref<8x8xf32, #tpu.memory_space<vmem>>, %arg2: memref<16x1xi32, #tpu.memory_space<vmem>>, %arg3: memref<16x1xi32, #tpu.memory_space<vmem>>, %arg4: memref<1x16xi32, #tpu.memory_space<vmem>>, %arg5: memref<16x1xi32, #tpu.memory_space<vmem>>, %arg6: memref<16x16xf32, #tpu.memory_space<vmem>>, %arg7: memref<32x128xf32, #tpu.memory_space<vmem>>, %arg8: memref<32x128xf32, #tpu.memory_space<vmem>>, %arg9: memref<16x128xf32, #tpu.memory_space<vmem>>, %arg10: memref<8x128xf32, #tpu.memory_space<vmem>>, %arg11: memref<1x128xf32, #tpu.memory_space<vmem>>, %arg12: memref<16x1xi32, #tpu.memory_space<vmem>>, %arg13: memref<16x1xi32, #tpu.memory_space<vmem>>, %arg14: memref<1x16xi32, #tpu.memory_space<vmem>>, %arg15: memref<16x1xi32, #tpu.memory_space<vmem>>, %arg16: memref<16x16xf32, #tpu.memory_space<vmem>>, %arg17: memref<32x128xf32, #tpu.memory_space<vmem>>, %arg18: memref<32x128xf32, #tpu.memory_space<vmem>>, %arg19: memref<16x128xf32, #tpu.memory_space<vmem>>, %arg20: memref<8x128xf32, #tpu.memory_space<vmem>>, %arg21: memref<1x128xf32, #tpu.memory_space<vmem>>, %arg22: memref<16x1xi32, #tpu.memory_space<vmem>>, %arg23: memref<16x1xi32, #tpu.memory_space<vmem>>, %arg24: memref<1x16xi32, #tpu.memory_space<vmem>>, %arg25: memref<16x1xi32, #tpu.memory_space<vmem>>, %arg26: memref<16x16xf32, #tpu.memory_space<vmem>>, %arg27: memref<32x128xf32, #tpu.memory_space<vmem>>, %arg28: memref<32x128xf32, #tpu.memory_space<vmem>>, %arg29: memref<16x128xf32, #tpu.memory_space<vmem>>, %arg30: memref<8x128xf32, #tpu.memory_space<vmem>>, %arg31: memref<1x128xf32, #tpu.memory_space<vmem>>, %arg32: memref<8x1xi32, #tpu.memory_space<vmem>>, %arg33: memref<1x8xi32, #tpu.memory_space<vmem>>, %arg34: memref<8x1xf32, #tpu.memory_space<vmem>>, %arg35: memref<8x32xf32, #tpu.memory_space<vmem>>, %arg36: memref<128x128xf32, #tpu.memory_space<vmem>>, %arg37: memref<32x128xf32, #tpu.memory_space<vmem>>, %arg38: memref<8x128xf32, #tpu.memory_space<vmem>>, %arg39: memref<1x128xf32, #tpu.memory_space<vmem>>, %arg40: memref<128x128xf32, #tpu.memory_space<vmem>>, %arg41: memref<16x1xi32, #tpu.memory_space<vmem>>, %arg42: memref<1x16xi32, #tpu.memory_space<vmem>>, %arg43: memref<8x1xf32, #tpu.memory_space<vmem>>, %arg44: memref<16x32xf32, #tpu.memory_space<vmem>>, %arg45: memref<128x128xf32, #tpu.memory_space<vmem>>, %arg46: memref<32x128xf32, #tpu.memory_space<vmem>>, %arg47: memref<8x128xf32, #tpu.memory_space<vmem>>, %arg48: memref<1x128xf32, #tpu.memory_space<vmem>>, %arg49: memref<128x128xf32, #tpu.memory_space<vmem>>, %arg50: memref<8x128xf32, #tpu.memory_space<vmem>>, %arg51: memref<1x128xf32, #tpu.memory_space<vmem>>, %arg52: memref<16x128xf32, #tpu.memory_space<vmem>>, %arg53: memref<16x128xf32, #tpu.memory_space<vmem>>, %arg54: memref<16x128xf32, #tpu.memory_space<vmem>>, %arg55: memref<8x128xf32, #tpu.memory_space<vmem>>, %arg56: memref<16x128xf32, #tpu.memory_space<vmem>>, %arg57: memref<8x128xf32, #tpu.memory_space<vmem>>) attributes {dimension_semantics = [#tpu.dimension_semantics<arbitrary>], iteration_bounds = array<i64: 1>, scalar_prefetch = 0 : i64, scratch_operands = 0 : i64, tpu.core_type = #tpu.core_type<tc>, window_params = [{pipeline_mode = #tpu.pipeline_mode<synchronous>, transform_indices = @transform_0, window_bounds = array<i64: 8, 8>}, {pipeline_mode = #tpu.pipeline_mode<synchronous>, transform_indices = @transform_1, window_bounds = array<i64: 16, 1>}, {pipeline_mode = #tpu.pipeline_mode<synchronous>, transform_indices = @transform_2, window_bounds = array<i64: 16, 1>}, {pipeline_mode = #tpu.pipeline_mode<synchronous>, transform_indices = @transform_3, window_bounds = array<i64: 1, 16>}, {pipeline_mode = #tpu.pipeline_mode<synchronous>, transform_indices = @transform_4, window_bounds = array<i64: 16, 1>}, {pipeline_mode = #tpu.pipeline_mode<synchronous>, transform_indices = @transform_5, window_bounds = array<i64: 16, 16>}, {pipeline_mode = #tpu.pipeline_mode<synchronous>, transform_indices = @transform_6, window_bounds = array<i64: 32, 128>}, {pipeline_mode = #tpu.pipeline_mode<synchronous>, transform_indices = @transform_7, window_bounds = array<i64: 32, 128>}, {pipeline_mode = #tpu.pipeline_mode<synchronous>, transform_indices = @transform_8, window_bounds = array<i64: 16, 128>}, {pipeline_mode = #tpu.pipeline_mode<synchronous>, transform_indices = @transform_9, window_bounds = array<i64: 8, 128>}, {pipeline_mode = #tpu.pipeline_mode<synchronous>, transform_indices = @transform_10, window_bounds = array<i64: 1, 128>}, {pipeline_mode = #tpu.pipeline_mode<synchronous>, transform_indices = @transform_11, window_bounds = array<i64: 16, 1>}, {pipeline_mode = #tpu.pipeline_mode<synchronous>, transform_indices = @transform_12, window_bounds = array<i64: 16, 1>}, {pipeline_mode = #tpu.pipeline_mode<synchronous>, transform_indices = @transform_13, window_bounds = array<i64: 1, 16>}, {pipeline_mode = #tpu.pipeline_mode<synchronous>, transform_indices = @transform_14, window_bounds = array<i64: 16, 1>}, {pipeline_mode = #tpu.pipeline_mode<synchronous>, transform_indices = @transform_15, window_bounds = array<i64: 16, 16>}, {pipeline_mode = #tpu.pipeline_mode<synchronous>, transform_indices = @transform_16, window_bounds = array<i64: 32, 128>}, {pipeline_mode = #tpu.pipeline_mode<synchronous>, transform_indices = @transform_17, window_bounds = array<i64: 32, 128>}, {pipeline_mode = #tpu.pipeline_mode<synchronous>, transform_indices = @transform_18, window_bounds = array<i64: 16, 128>}, {pipeline_mode = #tpu.pipeline_mode<synchronous>, transform_indices = @transform_19, window_bounds = array<i64: 8, 128>}, {pipeline_mode = #tpu.pipeline_mode<synchronous>, transform_indices = @transform_20, window_bounds = array<i64: 1, 128>}, {pipeline_mode = #tpu.pipeline_mode<synchronous>, transform_indices = @transform_21, window_bounds = array<i64: 16, 1>}, {pipeline_mode = #tpu.pipeline_mode<synchronous>, transform_indices = @transform_22, window_bounds = array<i64: 16, 1>}, {pipeline_mode = #tpu.pipeline_mode<synchronous>, transform_indices = @transform_23, window_bounds = array<i64: 1, 16>}, {pipeline_mode = #tpu.pipeline_mode<synchronous>, transform_indices = @transform_24, window_bounds = array<i64: 16, 1>}, {pipeline_mode = #tpu.pipeline_mode<synchronous>, transform_indices = @transform_25, window_bounds = array<i64: 16, 16>}, {pipeline_mode = #tpu.pipeline_mode<synchronous>, transform_indices = @transform_26, window_bounds = array<i64: 32, 128>}, {pipeline_mode = #tpu.pipeline_mode<synchronous>, transform_indices = @transform_27, window_bounds = array<i64: 32, 128>}, {pipeline_mode = #tpu.pipeline_mode<synchronous>, transform_indices = @transform_28, window_bounds = array<i64: 16, 128>}, {pipeline_mode = #tpu.pipeline_mode<synchronous>, transform_indices = @transform_29, window_bounds = array<i64: 8, 128>}, {pipeline_mode = #tpu.pipeline_mode<synchronous>, transform_indices = @transform_30, window_bounds = array<i64: 1, 128>}, {pipeline_mode = #tpu.pipeline_mode<synchronous>, transform_indices = @transform_31, window_bounds = array<i64: 8, 1>}, {pipeline_mode = #tpu.pipeline_mode<synchronous>, transform_indices = @transform_32, window_bounds = array<i64: 1, 8>}, {pipeline_mode = #tpu.pipeline_mode<synchronous>, transform_indices = @transform_33, window_bounds = array<i64: 8, 1>}, {pipeline_mode = #tpu.pipeline_mode<synchronous>, transform_indices = @transform_34, window_bounds = array<i64: 8, 32>}, {pipeline_mode = #tpu.pipeline_mode<synchronous>, transform_indices = @transform_35, window_bounds = array<i64: 128, 128>}, {pipeline_mode = #tpu.pipeline_mode<synchronous>, transform_indices = @transform_36, window_bounds = array<i64: 32, 128>}, {pipeline_mode = #tpu.pipeline_mode<synchronous>, transform_indices = @transform_37, window_bounds = array<i64: 8, 128>}, {pipeline_mode = #tpu.pipeline_mode<synchronous>, transform_indices = @transform_38, window_bounds = array<i64: 1, 128>}, {pipeline_mode = #tpu.pipeline_mode<synchronous>, transform_indices = @transform_39, window_bounds = array<i64: 128, 128>}, {pipeline_mode = #tpu.pipeline_mode<synchronous>, transform_indices = @transform_40, window_bounds = array<i64: 16, 1>}, {pipeline_mode = #tpu.pipeline_mode<synchronous>, transform_indices = @transform_41, window_bounds = array<i64: 1, 16>}, {pipeline_mode = #tpu.pipeline_mode<synchronous>, transform_indices = @transform_42, window_bounds = array<i64: 8, 1>}, {pipeline_mode = #tpu.pipeline_mode<synchronous>, transform_indices = @transform_43, window_bounds = array<i64: 16, 32>}, {pipeline_mode = #tpu.pipeline_mode<synchronous>, transform_indices = @transform_44, window_bounds = array<i64: 128, 128>}, {pipeline_mode = #tpu.pipeline_mode<synchronous>, transform_indices = @transform_45, window_bounds = array<i64: 32, 128>}, {pipeline_mode = #tpu.pipeline_mode<synchronous>, transform_indices = @transform_46, window_bounds = array<i64: 8, 128>}, {pipeline_mode = #tpu.pipeline_mode<synchronous>, transform_indices = @transform_47, window_bounds = array<i64: 1, 128>}, {pipeline_mode = #tpu.pipeline_mode<synchronous>, transform_indices = @transform_48, window_bounds = array<i64: 128, 128>}, {pipeline_mode = #tpu.pipeline_mode<synchronous>, transform_indices = @transform_49, window_bounds = array<i64: 8, 128>}, {pipeline_mode = #tpu.pipeline_mode<synchronous>, transform_indices = @transform_50, window_bounds = array<i64: 1, 128>}, {pipeline_mode = #tpu.pipeline_mode<synchronous>, transform_indices = @transform_51, window_bounds = array<i64: 16, 128>}, {pipeline_mode = #tpu.pipeline_mode<synchronous>, transform_indices = @transform_52, window_bounds = array<i64: 16, 128>}, {pipeline_mode = #tpu.pipeline_mode<synchronous>, transform_indices = @transform_53, window_bounds = array<i64: 16, 128>}, {pipeline_mode = #tpu.pipeline_mode<synchronous>, transform_indices = @transform_54, window_bounds = array<i64: 8, 128>}, {pipeline_mode = #tpu.pipeline_mode<synchronous>, transform_indices = @transform_55, window_bounds = array<i64: 16, 128>}, {pipeline_mode = #tpu.pipeline_mode<synchronous>, transform_indices = @transform_56, window_bounds = array<i64: 8, 128>}]} {
    %c0 = arith.constant 0 : index
    %c0_0 = arith.constant 0 : index
    %0 = vector.load %arg1[%c0, %c0_0] : memref<8x8xf32, #tpu.memory_space<vmem>>, vector<8x8xf32>
    %c0_1 = arith.constant 0 : index
    %c0_2 = arith.constant 0 : index
    %1 = vector.load %arg2[%c0_1, %c0_2] : memref<16x1xi32, #tpu.memory_space<vmem>>, vector<16x1xi32>
    %c0_3 = arith.constant 0 : index
    %c0_4 = arith.constant 0 : index
    %2 = vector.load %arg3[%c0_3, %c0_4] : memref<16x1xi32, #tpu.memory_space<vmem>>, vector<16x1xi32>
    %c0_5 = arith.constant 0 : index
    %c0_6 = arith.constant 0 : index
    %3 = vector.load %arg5[%c0_5, %c0_6] : memref<16x1xi32, #tpu.memory_space<vmem>>, vector<16x1xi32>
    %4 = tpu.iota {dimensions = array<i32: 1>} : vector<16x8xi32>
    %5 = vector.broadcast %1 : vector<16x1xi32> to vector<16x8xi32>
    %6 = arith.cmpi eq, %5, %4 : vector<16x8xi32>
    %7 = arith.extui %6 : vector<16x8xi1> to vector<16x8xi32>
    %8 = arith.sitofp %7 : vector<16x8xi32> to vector<16x8xf32>
    %9 = tpu.iota {dimensions = array<i32: 1>} : vector<16x16xi32>
    %10 = vector.broadcast %2 : vector<16x1xi32> to vector<16x16xi32>
    %11 = arith.cmpi eq, %10, %9 : vector<16x16xi32>
    %12 = arith.extui %11 : vector<16x16xi1> to vector<16x16xi32>
    %13 = arith.sitofp %12 : vector<16x16xi32> to vector<16x16xf32>
    %14 = tpu.iota {dimensions = array<i32: 1>} : vector<16x8xi32>
    %15 = vector.broadcast %3 : vector<16x1xi32> to vector<16x8xi32>
    %16 = arith.cmpi eq, %15, %14 : vector<16x8xi32>
    %17 = arith.extui %16 : vector<16x8xi1> to vector<16x8xi32>
    %18 = arith.sitofp %17 : vector<16x8xi32> to vector<16x8xf32>
    %c0_7 = arith.constant 0 : index
    %c0_8 = arith.constant 0 : index
    %19 = vector.load %arg35[%c0_7, %c0_8] : memref<8x32xf32, #tpu.memory_space<vmem>>, vector<8x32xf32>
    %cst = arith.constant dense<0.000000e+00> : vector<16x32xf32>
    %20 = tpu.matmul %8, %19, %cst {dimension_numbers = #tpu.dot_dimension_numbers<[1], [0], [0], [1], [0, 0, 1, 1], [], []>} : vector<16x8xf32>, vector<8x32xf32>, vector<16x32xf32> -> vector<16x32xf32>
    %c0_9 = arith.constant 0 : index
    %c0_10 = arith.constant 0 : index
    %21 = vector.load %arg44[%c0_9, %c0_10] : memref<16x32xf32, #tpu.memory_space<vmem>>, vector<16x32xf32>
    %cst_11 = arith.constant dense<0.000000e+00> : vector<16x32xf32>
    %22 = tpu.matmul %13, %21, %cst_11 {dimension_numbers = #tpu.dot_dimension_numbers<[1], [0], [0], [1], [0, 0, 1, 1], [], []>} : vector<16x16xf32>, vector<16x32xf32>, vector<16x32xf32> -> vector<16x32xf32>
    %cst_12 = arith.constant dense<0.000000e+00> : vector<16x8xf32>
    %23 = tpu.matmul %18, %0, %cst_12 {dimension_numbers = #tpu.dot_dimension_numbers<[1], [0], [0], [1], [0, 0, 1, 1], [], []>} : vector<16x8xf32>, vector<8x8xf32>, vector<16x8xf32> -> vector<16x8xf32>
    %c0_13 = arith.constant 0 : index
    %c0_14 = arith.constant 0 : index
    %24 = vector.load %arg7[%c0_13, %c0_14] : memref<32x128xf32, #tpu.memory_space<vmem>>, vector<32x128xf32>
    %cst_15 = arith.constant dense<0.000000e+00> : vector<16x128xf32>
    %25 = tpu.matmul %20, %24, %cst_15 {dimension_numbers = #tpu.dot_dimension_numbers<[1], [0], [0], [1], [0, 0, 1, 1], [], []>} : vector<16x32xf32>, vector<32x128xf32>, vector<16x128xf32> -> vector<16x128xf32>
    %c0_16 = arith.constant 0 : index
    %c0_17 = arith.constant 0 : index
    %26 = vector.load %arg8[%c0_16, %c0_17] : memref<32x128xf32, #tpu.memory_space<vmem>>, vector<32x128xf32>
    %cst_18 = arith.constant dense<0.000000e+00> : vector<16x128xf32>
    %27 = tpu.matmul %22, %26, %cst_18 {dimension_numbers = #tpu.dot_dimension_numbers<[1], [0], [0], [1], [0, 0, 1, 1], [], []>} : vector<16x32xf32>, vector<32x128xf32>, vector<16x128xf32> -> vector<16x128xf32>
    %28 = arith.addf %25, %27 : vector<16x128xf32>
    %c0_19 = arith.constant 0 : index
    %c0_20 = arith.constant 0 : index
    %29 = vector.load %arg6[%c0_19, %c0_20] : memref<16x16xf32, #tpu.memory_space<vmem>>, vector<16x16xf32>
    %c0_21 = arith.constant 0 : index
    %c0_22 = arith.constant 0 : index
    %30 = vector.load %arg9[%c0_21, %c0_22] : memref<16x128xf32, #tpu.memory_space<vmem>>, vector<16x128xf32>
    %cst_23 = arith.constant dense<0.000000e+00> : vector<16x128xf32>
    %31 = tpu.matmul %29, %30, %cst_23 {dimension_numbers = #tpu.dot_dimension_numbers<[1], [0], [0], [1], [0, 0, 1, 1], [], []>} : vector<16x16xf32>, vector<16x128xf32>, vector<16x128xf32> -> vector<16x128xf32>
    %32 = arith.addf %28, %31 : vector<16x128xf32>
    %c0_24 = arith.constant 0 : index
    %c0_25 = arith.constant 0 : index
    %33 = vector.load %arg10[%c0_24, %c0_25] : memref<8x128xf32, #tpu.memory_space<vmem>>, vector<8x128xf32>
    %cst_26 = arith.constant dense<0.000000e+00> : vector<16x128xf32>
    %34 = tpu.matmul %23, %33, %cst_26 {dimension_numbers = #tpu.dot_dimension_numbers<[1], [0], [0], [1], [0, 0, 1, 1], [], []>} : vector<16x8xf32>, vector<8x128xf32>, vector<16x128xf32> -> vector<16x128xf32>
    %35 = arith.addf %32, %34 : vector<16x128xf32>
    %c0_27 = arith.constant 0 : index
    %c0_28 = arith.constant 0 : index
    %36 = vector.load %arg11[%c0_27, %c0_28] : memref<1x128xf32, #tpu.memory_space<vmem>>, vector<1x128xf32>
    %37 = vector.broadcast %36 : vector<1x128xf32> to vector<16x128xf32>
    %38 = arith.addf %35, %37 : vector<16x128xf32>
    %c0_i32 = arith.constant 0 : i32
    %39 = vector.broadcast %c0_i32 : i32 to vector<16x1xi32>
    %40 = arith.cmpi sge, %1, %39 : vector<16x1xi32>
    %41 = arith.extui %40 : vector<16x1xi1> to vector<16x1xi32>
    %42 = arith.sitofp %41 : vector<16x1xi32> to vector<16x1xf32>
    %cst_29 = arith.constant 0.000000e+00 : f32
    %43 = vector.broadcast %cst_29 : f32 to vector<16x128xf32>
    %44 = arith.maximumf %38, %43 : vector<16x128xf32>
    %45 = vector.broadcast %42 : vector<16x1xf32> to vector<16x128xf32>
    %46 = arith.mulf %44, %45 : vector<16x128xf32>
    %c0_30 = arith.constant 0 : index
    %c0_31 = arith.constant 0 : index
    %47 = vector.load %arg52[%c0_30, %c0_31] : memref<16x128xf32, #tpu.memory_space<vmem>>, vector<16x128xf32>
    tpu.vector_store %arg52[%c0_30, %c0_31], %46 {strides = array<i32>} : memref<16x128xf32, #tpu.memory_space<vmem>>, vector<16x128xf32>,
    %c0_32 = arith.constant 0 : index
    %c0_33 = arith.constant 0 : index
    %48 = vector.load %arg12[%c0_32, %c0_33] : memref<16x1xi32, #tpu.memory_space<vmem>>, vector<16x1xi32>
    %c0_34 = arith.constant 0 : index
    %c0_35 = arith.constant 0 : index
    %49 = vector.load %arg13[%c0_34, %c0_35] : memref<16x1xi32, #tpu.memory_space<vmem>>, vector<16x1xi32>
    %c0_36 = arith.constant 0 : index
    %c0_37 = arith.constant 0 : index
    %50 = vector.load %arg15[%c0_36, %c0_37] : memref<16x1xi32, #tpu.memory_space<vmem>>, vector<16x1xi32>
    %51 = tpu.iota {dimensions = array<i32: 1>} : vector<16x16xi32>
    %52 = vector.broadcast %48 : vector<16x1xi32> to vector<16x16xi32>
    %53 = arith.cmpi eq, %52, %51 : vector<16x16xi32>
    %54 = arith.extui %53 : vector<16x16xi1> to vector<16x16xi32>
    %55 = arith.sitofp %54 : vector<16x16xi32> to vector<16x16xf32>
    %56 = tpu.iota {dimensions = array<i32: 1>} : vector<16x8xi32>
    %57 = vector.broadcast %49 : vector<16x1xi32> to vector<16x8xi32>
    %58 = arith.cmpi eq, %57, %56 : vector<16x8xi32>
    %59 = arith.extui %58 : vector<16x8xi1> to vector<16x8xi32>
    %60 = arith.sitofp %59 : vector<16x8xi32> to vector<16x8xf32>
    %61 = tpu.iota {dimensions = array<i32: 1>} : vector<16x8xi32>
    %62 = vector.broadcast %50 : vector<16x1xi32> to vector<16x8xi32>
    %63 = arith.cmpi eq, %62, %61 : vector<16x8xi32>
    %64 = arith.extui %63 : vector<16x8xi1> to vector<16x8xi32>
    %65 = arith.sitofp %64 : vector<16x8xi32> to vector<16x8xf32>
    %c0_38 = arith.constant 0 : index
    %c0_39 = arith.constant 0 : index
    %66 = vector.load %arg44[%c0_38, %c0_39] : memref<16x32xf32, #tpu.memory_space<vmem>>, vector<16x32xf32>
    %cst_40 = arith.constant dense<0.000000e+00> : vector<16x32xf32>
    %67 = tpu.matmul %55, %66, %cst_40 {dimension_numbers = #tpu.dot_dimension_numbers<[1], [0], [0], [1], [0, 0, 1, 1], [], []>} : vector<16x16xf32>, vector<16x32xf32>, vector<16x32xf32> -> vector<16x32xf32>
    %c0_41 = arith.constant 0 : index
    %c0_42 = arith.constant 0 : index
    %68 = vector.load %arg35[%c0_41, %c0_42] : memref<8x32xf32, #tpu.memory_space<vmem>>, vector<8x32xf32>
    %cst_43 = arith.constant dense<0.000000e+00> : vector<16x32xf32>
    %69 = tpu.matmul %60, %68, %cst_43 {dimension_numbers = #tpu.dot_dimension_numbers<[1], [0], [0], [1], [0, 0, 1, 1], [], []>} : vector<16x8xf32>, vector<8x32xf32>, vector<16x32xf32> -> vector<16x32xf32>
    %cst_44 = arith.constant dense<0.000000e+00> : vector<16x8xf32>
    %70 = tpu.matmul %65, %0, %cst_44 {dimension_numbers = #tpu.dot_dimension_numbers<[1], [0], [0], [1], [0, 0, 1, 1], [], []>} : vector<16x8xf32>, vector<8x8xf32>, vector<16x8xf32> -> vector<16x8xf32>
    %c0_45 = arith.constant 0 : index
    %c0_46 = arith.constant 0 : index
    %71 = vector.load %arg17[%c0_45, %c0_46] : memref<32x128xf32, #tpu.memory_space<vmem>>, vector<32x128xf32>
    %cst_47 = arith.constant dense<0.000000e+00> : vector<16x128xf32>
    %72 = tpu.matmul %67, %71, %cst_47 {dimension_numbers = #tpu.dot_dimension_numbers<[1], [0], [0], [1], [0, 0, 1, 1], [], []>} : vector<16x32xf32>, vector<32x128xf32>, vector<16x128xf32> -> vector<16x128xf32>
    %c0_48 = arith.constant 0 : index
    %c0_49 = arith.constant 0 : index
    %73 = vector.load %arg18[%c0_48, %c0_49] : memref<32x128xf32, #tpu.memory_space<vmem>>, vector<32x128xf32>
    %cst_50 = arith.constant dense<0.000000e+00> : vector<16x128xf32>
    %74 = tpu.matmul %69, %73, %cst_50 {dimension_numbers = #tpu.dot_dimension_numbers<[1], [0], [0], [1], [0, 0, 1, 1], [], []>} : vector<16x32xf32>, vector<32x128xf32>, vector<16x128xf32> -> vector<16x128xf32>
    %75 = arith.addf %72, %74 : vector<16x128xf32>
    %c0_51 = arith.constant 0 : index
    %c0_52 = arith.constant 0 : index
    %76 = vector.load %arg16[%c0_51, %c0_52] : memref<16x16xf32, #tpu.memory_space<vmem>>, vector<16x16xf32>
    %c0_53 = arith.constant 0 : index
    %c0_54 = arith.constant 0 : index
    %77 = vector.load %arg19[%c0_53, %c0_54] : memref<16x128xf32, #tpu.memory_space<vmem>>, vector<16x128xf32>
    %cst_55 = arith.constant dense<0.000000e+00> : vector<16x128xf32>
    %78 = tpu.matmul %76, %77, %cst_55 {dimension_numbers = #tpu.dot_dimension_numbers<[1], [0], [0], [1], [0, 0, 1, 1], [], []>} : vector<16x16xf32>, vector<16x128xf32>, vector<16x128xf32> -> vector<16x128xf32>
    %79 = arith.addf %75, %78 : vector<16x128xf32>
    %c0_56 = arith.constant 0 : index
    %c0_57 = arith.constant 0 : index
    %80 = vector.load %arg20[%c0_56, %c0_57] : memref<8x128xf32, #tpu.memory_space<vmem>>, vector<8x128xf32>
    %cst_58 = arith.constant dense<0.000000e+00> : vector<16x128xf32>
    %81 = tpu.matmul %70, %80, %cst_58 {dimension_numbers = #tpu.dot_dimension_numbers<[1], [0], [0], [1], [0, 0, 1, 1], [], []>} : vector<16x8xf32>, vector<8x128xf32>, vector<16x128xf32> -> vector<16x128xf32>
    %82 = arith.addf %79, %81 : vector<16x128xf32>
    %c0_59 = arith.constant 0 : index
    %c0_60 = arith.constant 0 : index
    %83 = vector.load %arg21[%c0_59, %c0_60] : memref<1x128xf32, #tpu.memory_space<vmem>>, vector<1x128xf32>
    %84 = vector.broadcast %83 : vector<1x128xf32> to vector<16x128xf32>
    %85 = arith.addf %82, %84 : vector<16x128xf32>
    %c0_i32_61 = arith.constant 0 : i32
    %86 = vector.broadcast %c0_i32_61 : i32 to vector<16x1xi32>
    %87 = arith.cmpi sge, %48, %86 : vector<16x1xi32>
    %88 = arith.extui %87 : vector<16x1xi1> to vector<16x1xi32>
    %89 = arith.sitofp %88 : vector<16x1xi32> to vector<16x1xf32>
    %cst_62 = arith.constant 0.000000e+00 : f32
    %90 = vector.broadcast %cst_62 : f32 to vector<16x128xf32>
    %91 = arith.maximumf %85, %90 : vector<16x128xf32>
    %92 = vector.broadcast %89 : vector<16x1xf32> to vector<16x128xf32>
    %93 = arith.mulf %91, %92 : vector<16x128xf32>
    %c0_63 = arith.constant 0 : index
    %c0_64 = arith.constant 0 : index
    %94 = vector.load %arg53[%c0_63, %c0_64] : memref<16x128xf32, #tpu.memory_space<vmem>>, vector<16x128xf32>
    tpu.vector_store %arg53[%c0_63, %c0_64], %93 {strides = array<i32>} : memref<16x128xf32, #tpu.memory_space<vmem>>, vector<16x128xf32>,
    %c0_65 = arith.constant 0 : index
    %c0_66 = arith.constant 0 : index
    %95 = vector.load %arg22[%c0_65, %c0_66] : memref<16x1xi32, #tpu.memory_space<vmem>>, vector<16x1xi32>
    %c0_67 = arith.constant 0 : index
    %c0_68 = arith.constant 0 : index
    %96 = vector.load %arg23[%c0_67, %c0_68] : memref<16x1xi32, #tpu.memory_space<vmem>>, vector<16x1xi32>
    %c0_69 = arith.constant 0 : index
    %c0_70 = arith.constant 0 : index
    %97 = vector.load %arg25[%c0_69, %c0_70] : memref<16x1xi32, #tpu.memory_space<vmem>>, vector<16x1xi32>
    %98 = tpu.iota {dimensions = array<i32: 1>} : vector<16x8xi32>
    %99 = vector.broadcast %95 : vector<16x1xi32> to vector<16x8xi32>
    %100 = arith.cmpi eq, %99, %98 : vector<16x8xi32>
    %101 = arith.extui %100 : vector<16x8xi1> to vector<16x8xi32>
    %102 = arith.sitofp %101 : vector<16x8xi32> to vector<16x8xf32>
    %103 = tpu.iota {dimensions = array<i32: 1>} : vector<16x16xi32>
    %104 = vector.broadcast %96 : vector<16x1xi32> to vector<16x16xi32>
    %105 = arith.cmpi eq, %104, %103 : vector<16x16xi32>
    %106 = arith.extui %105 : vector<16x16xi1> to vector<16x16xi32>
    %107 = arith.sitofp %106 : vector<16x16xi32> to vector<16x16xf32>
    %108 = tpu.iota {dimensions = array<i32: 1>} : vector<16x8xi32>
    %109 = vector.broadcast %97 : vector<16x1xi32> to vector<16x8xi32>
    %110 = arith.cmpi eq, %109, %108 : vector<16x8xi32>
    %111 = arith.extui %110 : vector<16x8xi1> to vector<16x8xi32>
    %112 = arith.sitofp %111 : vector<16x8xi32> to vector<16x8xf32>
    %c0_71 = arith.constant 0 : index
    %c0_72 = arith.constant 0 : index
    %113 = vector.load %arg35[%c0_71, %c0_72] : memref<8x32xf32, #tpu.memory_space<vmem>>, vector<8x32xf32>
    %cst_73 = arith.constant dense<0.000000e+00> : vector<16x32xf32>
    %114 = tpu.matmul %102, %113, %cst_73 {dimension_numbers = #tpu.dot_dimension_numbers<[1], [0], [0], [1], [0, 0, 1, 1], [], []>} : vector<16x8xf32>, vector<8x32xf32>, vector<16x32xf32> -> vector<16x32xf32>
    %c0_74 = arith.constant 0 : index
    %c0_75 = arith.constant 0 : index
    %115 = vector.load %arg44[%c0_74, %c0_75] : memref<16x32xf32, #tpu.memory_space<vmem>>, vector<16x32xf32>
    %cst_76 = arith.constant dense<0.000000e+00> : vector<16x32xf32>
    %116 = tpu.matmul %107, %115, %cst_76 {dimension_numbers = #tpu.dot_dimension_numbers<[1], [0], [0], [1], [0, 0, 1, 1], [], []>} : vector<16x16xf32>, vector<16x32xf32>, vector<16x32xf32> -> vector<16x32xf32>
    %cst_77 = arith.constant dense<0.000000e+00> : vector<16x8xf32>
    %117 = tpu.matmul %112, %0, %cst_77 {dimension_numbers = #tpu.dot_dimension_numbers<[1], [0], [0], [1], [0, 0, 1, 1], [], []>} : vector<16x8xf32>, vector<8x8xf32>, vector<16x8xf32> -> vector<16x8xf32>
    %c0_78 = arith.constant 0 : index
    %c0_79 = arith.constant 0 : index
    %118 = vector.load %arg27[%c0_78, %c0_79] : memref<32x128xf32, #tpu.memory_space<vmem>>, vector<32x128xf32>
    %cst_80 = arith.constant dense<0.000000e+00> : vector<16x128xf32>
    %119 = tpu.matmul %114, %118, %cst_80 {dimension_numbers = #tpu.dot_dimension_numbers<[1], [0], [0], [1], [0, 0, 1, 1], [], []>} : vector<16x32xf32>, vector<32x128xf32>, vector<16x128xf32> -> vector<16x128xf32>
    %c0_81 = arith.constant 0 : index
    %c0_82 = arith.constant 0 : index
    %120 = vector.load %arg28[%c0_81, %c0_82] : memref<32x128xf32, #tpu.memory_space<vmem>>, vector<32x128xf32>
    %cst_83 = arith.constant dense<0.000000e+00> : vector<16x128xf32>
    %121 = tpu.matmul %116, %120, %cst_83 {dimension_numbers = #tpu.dot_dimension_numbers<[1], [0], [0], [1], [0, 0, 1, 1], [], []>} : vector<16x32xf32>, vector<32x128xf32>, vector<16x128xf32> -> vector<16x128xf32>
    %122 = arith.addf %119, %121 : vector<16x128xf32>
    %c0_84 = arith.constant 0 : index
    %c0_85 = arith.constant 0 : index
    %123 = vector.load %arg26[%c0_84, %c0_85] : memref<16x16xf32, #tpu.memory_space<vmem>>, vector<16x16xf32>
    %c0_86 = arith.constant 0 : index
    %c0_87 = arith.constant 0 : index
    %124 = vector.load %arg29[%c0_86, %c0_87] : memref<16x128xf32, #tpu.memory_space<vmem>>, vector<16x128xf32>
    %cst_88 = arith.constant dense<0.000000e+00> : vector<16x128xf32>
    %125 = tpu.matmul %123, %124, %cst_88 {dimension_numbers = #tpu.dot_dimension_numbers<[1], [0], [0], [1], [0, 0, 1, 1], [], []>} : vector<16x16xf32>, vector<16x128xf32>, vector<16x128xf32> -> vector<16x128xf32>
    %126 = arith.addf %122, %125 : vector<16x128xf32>
    %c0_89 = arith.constant 0 : index
    %c0_90 = arith.constant 0 : index
    %127 = vector.load %arg30[%c0_89, %c0_90] : memref<8x128xf32, #tpu.memory_space<vmem>>, vector<8x128xf32>
    %cst_91 = arith.constant dense<0.000000e+00> : vector<16x128xf32>
    %128 = tpu.matmul %117, %127, %cst_91 {dimension_numbers = #tpu.dot_dimension_numbers<[1], [0], [0], [1], [0, 0, 1, 1], [], []>} : vector<16x8xf32>, vector<8x128xf32>, vector<16x128xf32> -> vector<16x128xf32>
    %129 = arith.addf %126, %128 : vector<16x128xf32>
    %c0_92 = arith.constant 0 : index
    %c0_93 = arith.constant 0 : index
    %130 = vector.load %arg31[%c0_92, %c0_93] : memref<1x128xf32, #tpu.memory_space<vmem>>, vector<1x128xf32>
    %131 = vector.broadcast %130 : vector<1x128xf32> to vector<16x128xf32>
    %132 = arith.addf %129, %131 : vector<16x128xf32>
    %c0_i32_94 = arith.constant 0 : i32
    %133 = vector.broadcast %c0_i32_94 : i32 to vector<16x1xi32>
    %134 = arith.cmpi sge, %95, %133 : vector<16x1xi32>
    %135 = arith.extui %134 : vector<16x1xi1> to vector<16x1xi32>
    %136 = arith.sitofp %135 : vector<16x1xi32> to vector<16x1xf32>
    %cst_95 = arith.constant 0.000000e+00 : f32
    %137 = vector.broadcast %cst_95 : f32 to vector<16x128xf32>
    %138 = arith.maximumf %132, %137 : vector<16x128xf32>
    %139 = vector.broadcast %136 : vector<16x1xf32> to vector<16x128xf32>
    %140 = arith.mulf %138, %139 : vector<16x128xf32>
    %c0_96 = arith.constant 0 : index
    %c0_97 = arith.constant 0 : index
    %141 = vector.load %arg54[%c0_96, %c0_97] : memref<16x128xf32, #tpu.memory_space<vmem>>, vector<16x128xf32>
    tpu.vector_store %arg54[%c0_96, %c0_97], %140 {strides = array<i32>} : memref<16x128xf32, #tpu.memory_space<vmem>>, vector<16x128xf32>,
    %c0_98 = arith.constant 0 : index
    %c0_99 = arith.constant 0 : index
    %142 = vector.load %arg35[%c0_98, %c0_99] : memref<8x32xf32, #tpu.memory_space<vmem>>, vector<8x32xf32>
    %c0_100 = arith.constant 0 : index
    %c0_101 = arith.constant 0 : index
    %143 = vector.load %arg37[%c0_100, %c0_101] : memref<32x128xf32, #tpu.memory_space<vmem>>, vector<32x128xf32>
    %cst_102 = arith.constant dense<0.000000e+00> : vector<8x128xf32>
    %144 = tpu.matmul %142, %143, %cst_102 {dimension_numbers = #tpu.dot_dimension_numbers<[1], [0], [0], [1], [0, 0, 1, 1], [], []>} : vector<8x32xf32>, vector<32x128xf32>, vector<8x128xf32> -> vector<8x128xf32>
    %c0_103 = arith.constant 0 : index
    %c0_104 = arith.constant 0 : index
    %145 = vector.load %arg14[%c0_103, %c0_104] : memref<1x16xi32, #tpu.memory_space<vmem>>, vector<1x16xi32>
    %c0_105 = arith.constant 0 : index
    %c0_106 = arith.constant 0 : index
    %146 = vector.load %arg53[%c0_105, %c0_106] : memref<16x128xf32, #tpu.memory_space<vmem>>, vector<16x128xf32>
    %147 = tpu.iota {dimensions = array<i32: 0>} : vector<8x16xi32>
    %148 = vector.broadcast %145 : vector<1x16xi32> to vector<8x16xi32>
    %149 = arith.cmpi eq, %148, %147 : vector<8x16xi32>
    %150 = arith.extui %149 : vector<8x16xi1> to vector<8x16xi32>
    %151 = arith.sitofp %150 : vector<8x16xi32> to vector<8x16xf32>
    %cst_107 = arith.constant dense<0.000000e+00> : vector<8x128xf32>
    %152 = tpu.matmul %151, %146, %cst_107 {dimension_numbers = #tpu.dot_dimension_numbers<[1], [0], [0], [1], [0, 0, 1, 1], [], []>} : vector<8x16xf32>, vector<16x128xf32>, vector<8x128xf32> -> vector<8x128xf32>
    %c0_108 = arith.constant 0 : index
    %c0_109 = arith.constant 0 : index
    %153 = vector.load %arg36[%c0_108, %c0_109] : memref<128x128xf32, #tpu.memory_space<vmem>>, vector<128x128xf32>
    %cst_110 = arith.constant dense<0.000000e+00> : vector<8x128xf32>
    %154 = tpu.matmul %152, %153, %cst_110 {dimension_numbers = #tpu.dot_dimension_numbers<[1], [0], [0], [1], [0, 0, 1, 1], [], []>} : vector<8x128xf32>, vector<128x128xf32>, vector<8x128xf32> -> vector<8x128xf32>
    %155 = arith.addf %144, %154 : vector<8x128xf32>
    %c0_111 = arith.constant 0 : index
    %c0_112 = arith.constant 0 : index
    %156 = vector.load %arg32[%c0_111, %c0_112] : memref<8x1xi32, #tpu.memory_space<vmem>>, vector<8x1xi32>
    %157 = tpu.iota {dimensions = array<i32: 1>} : vector<8x8xi32>
    %158 = vector.broadcast %156 : vector<8x1xi32> to vector<8x8xi32>
    %159 = arith.cmpi eq, %158, %157 : vector<8x8xi32>
    %160 = arith.extui %159 : vector<8x8xi1> to vector<8x8xi32>
    %161 = arith.sitofp %160 : vector<8x8xi32> to vector<8x8xf32>
    %cst_113 = arith.constant dense<0.000000e+00> : vector<8x8xf32>
    %162 = tpu.matmul %161, %0, %cst_113 {dimension_numbers = #tpu.dot_dimension_numbers<[1], [0], [0], [1], [0, 0, 1, 1], [], []>} : vector<8x8xf32>, vector<8x8xf32>, vector<8x8xf32> -> vector<8x8xf32>
    %c0_114 = arith.constant 0 : index
    %c0_115 = arith.constant 0 : index
    %163 = vector.load %arg38[%c0_114, %c0_115] : memref<8x128xf32, #tpu.memory_space<vmem>>, vector<8x128xf32>
    %cst_116 = arith.constant dense<0.000000e+00> : vector<8x128xf32>
    %164 = tpu.matmul %162, %163, %cst_116 {dimension_numbers = #tpu.dot_dimension_numbers<[1], [0], [0], [1], [0, 0, 1, 1], [], []>} : vector<8x8xf32>, vector<8x128xf32>, vector<8x128xf32> -> vector<8x128xf32>
    %165 = arith.addf %155, %164 : vector<8x128xf32>
    %c0_117 = arith.constant 0 : index
    %c0_118 = arith.constant 0 : index
    %166 = vector.load %arg39[%c0_117, %c0_118] : memref<1x128xf32, #tpu.memory_space<vmem>>, vector<1x128xf32>
    %167 = vector.broadcast %166 : vector<1x128xf32> to vector<8x128xf32>
    %168 = arith.addf %165, %167 : vector<8x128xf32>
    %c0_i32_119 = arith.constant 0 : i32
    %169 = vector.broadcast %c0_i32_119 : i32 to vector<8x1xi32>
    %170 = arith.cmpi sge, %156, %169 : vector<8x1xi32>
    %171 = arith.extui %170 : vector<8x1xi1> to vector<8x1xi32>
    %172 = arith.sitofp %171 : vector<8x1xi32> to vector<8x1xf32>
    %cst_120 = arith.constant 0.000000e+00 : f32
    %173 = vector.broadcast %cst_120 : f32 to vector<8x128xf32>
    %174 = arith.maximumf %168, %173 : vector<8x128xf32>
    %175 = vector.broadcast %172 : vector<8x1xf32> to vector<8x128xf32>
    %176 = arith.mulf %174, %175 : vector<8x128xf32>
    %c0_121 = arith.constant 0 : index
    %c0_122 = arith.constant 0 : index
    %177 = vector.load %arg55[%c0_121, %c0_122] : memref<8x128xf32, #tpu.memory_space<vmem>>, vector<8x128xf32>
    tpu.vector_store %arg55[%c0_121, %c0_122], %176 {strides = array<i32>} : memref<8x128xf32, #tpu.memory_space<vmem>>, vector<8x128xf32>,
    %c0_123 = arith.constant 0 : index
    %c0_124 = arith.constant 0 : index
    %178 = vector.load %arg44[%c0_123, %c0_124] : memref<16x32xf32, #tpu.memory_space<vmem>>, vector<16x32xf32>
    %c0_125 = arith.constant 0 : index
    %c0_126 = arith.constant 0 : index
    %179 = vector.load %arg46[%c0_125, %c0_126] : memref<32x128xf32, #tpu.memory_space<vmem>>, vector<32x128xf32>
    %cst_127 = arith.constant dense<0.000000e+00> : vector<16x128xf32>
    %180 = tpu.matmul %178, %179, %cst_127 {dimension_numbers = #tpu.dot_dimension_numbers<[1], [0], [0], [1], [0, 0, 1, 1], [], []>} : vector<16x32xf32>, vector<32x128xf32>, vector<16x128xf32> -> vector<16x128xf32>
    %c0_128 = arith.constant 0 : index
    %c0_129 = arith.constant 0 : index
    %181 = vector.load %arg4[%c0_128, %c0_129] : memref<1x16xi32, #tpu.memory_space<vmem>>, vector<1x16xi32>
    %c0_130 = arith.constant 0 : index
    %c0_131 = arith.constant 0 : index
    %182 = vector.load %arg52[%c0_130, %c0_131] : memref<16x128xf32, #tpu.memory_space<vmem>>, vector<16x128xf32>
    %183 = tpu.iota {dimensions = array<i32: 0>} : vector<16x16xi32>
    %184 = vector.broadcast %181 : vector<1x16xi32> to vector<16x16xi32>
    %185 = arith.cmpi eq, %184, %183 : vector<16x16xi32>
    %186 = arith.extui %185 : vector<16x16xi1> to vector<16x16xi32>
    %187 = arith.sitofp %186 : vector<16x16xi32> to vector<16x16xf32>
    %cst_132 = arith.constant dense<0.000000e+00> : vector<16x128xf32>
    %188 = tpu.matmul %187, %182, %cst_132 {dimension_numbers = #tpu.dot_dimension_numbers<[1], [0], [0], [1], [0, 0, 1, 1], [], []>} : vector<16x16xf32>, vector<16x128xf32>, vector<16x128xf32> -> vector<16x128xf32>
    %c0_133 = arith.constant 0 : index
    %c0_134 = arith.constant 0 : index
    %189 = vector.load %arg24[%c0_133, %c0_134] : memref<1x16xi32, #tpu.memory_space<vmem>>, vector<1x16xi32>
    %c0_135 = arith.constant 0 : index
    %c0_136 = arith.constant 0 : index
    %190 = vector.load %arg54[%c0_135, %c0_136] : memref<16x128xf32, #tpu.memory_space<vmem>>, vector<16x128xf32>
    %191 = tpu.iota {dimensions = array<i32: 0>} : vector<16x16xi32>
    %192 = vector.broadcast %189 : vector<1x16xi32> to vector<16x16xi32>
    %193 = arith.cmpi eq, %192, %191 : vector<16x16xi32>
    %194 = arith.extui %193 : vector<16x16xi1> to vector<16x16xi32>
    %195 = arith.sitofp %194 : vector<16x16xi32> to vector<16x16xf32>
    %cst_137 = arith.constant dense<0.000000e+00> : vector<16x128xf32>
    %196 = tpu.matmul %195, %190, %cst_137 {dimension_numbers = #tpu.dot_dimension_numbers<[1], [0], [0], [1], [0, 0, 1, 1], [], []>} : vector<16x16xf32>, vector<16x128xf32>, vector<16x128xf32> -> vector<16x128xf32>
    %197 = arith.addf %188, %196 : vector<16x128xf32>
    %c0_138 = arith.constant 0 : index
    %c0_139 = arith.constant 0 : index
    %198 = vector.load %arg45[%c0_138, %c0_139] : memref<128x128xf32, #tpu.memory_space<vmem>>, vector<128x128xf32>
    %cst_140 = arith.constant dense<0.000000e+00> : vector<16x128xf32>
    %199 = tpu.matmul %197, %198, %cst_140 {dimension_numbers = #tpu.dot_dimension_numbers<[1], [0], [0], [1], [0, 0, 1, 1], [], []>} : vector<16x128xf32>, vector<128x128xf32>, vector<16x128xf32> -> vector<16x128xf32>
    %200 = arith.addf %180, %199 : vector<16x128xf32>
    %c0_141 = arith.constant 0 : index
    %c0_142 = arith.constant 0 : index
    %201 = vector.load %arg41[%c0_141, %c0_142] : memref<16x1xi32, #tpu.memory_space<vmem>>, vector<16x1xi32>
    %202 = tpu.iota {dimensions = array<i32: 1>} : vector<16x8xi32>
    %203 = vector.broadcast %201 : vector<16x1xi32> to vector<16x8xi32>
    %204 = arith.cmpi eq, %203, %202 : vector<16x8xi32>
    %205 = arith.extui %204 : vector<16x8xi1> to vector<16x8xi32>
    %206 = arith.sitofp %205 : vector<16x8xi32> to vector<16x8xf32>
    %cst_143 = arith.constant dense<0.000000e+00> : vector<16x8xf32>
    %207 = tpu.matmul %206, %0, %cst_143 {dimension_numbers = #tpu.dot_dimension_numbers<[1], [0], [0], [1], [0, 0, 1, 1], [], []>} : vector<16x8xf32>, vector<8x8xf32>, vector<16x8xf32> -> vector<16x8xf32>
    %c0_144 = arith.constant 0 : index
    %c0_145 = arith.constant 0 : index
    %208 = vector.load %arg47[%c0_144, %c0_145] : memref<8x128xf32, #tpu.memory_space<vmem>>, vector<8x128xf32>
    %cst_146 = arith.constant dense<0.000000e+00> : vector<16x128xf32>
    %209 = tpu.matmul %207, %208, %cst_146 {dimension_numbers = #tpu.dot_dimension_numbers<[1], [0], [0], [1], [0, 0, 1, 1], [], []>} : vector<16x8xf32>, vector<8x128xf32>, vector<16x128xf32> -> vector<16x128xf32>
    %210 = arith.addf %200, %209 : vector<16x128xf32>
    %c0_147 = arith.constant 0 : index
    %c0_148 = arith.constant 0 : index
    %211 = vector.load %arg48[%c0_147, %c0_148] : memref<1x128xf32, #tpu.memory_space<vmem>>, vector<1x128xf32>
    %212 = vector.broadcast %211 : vector<1x128xf32> to vector<16x128xf32>
    %213 = arith.addf %210, %212 : vector<16x128xf32>
    %c0_i32_149 = arith.constant 0 : i32
    %214 = vector.broadcast %c0_i32_149 : i32 to vector<16x1xi32>
    %215 = arith.cmpi sge, %201, %214 : vector<16x1xi32>
    %216 = arith.extui %215 : vector<16x1xi1> to vector<16x1xi32>
    %217 = arith.sitofp %216 : vector<16x1xi32> to vector<16x1xf32>
    %cst_150 = arith.constant 0.000000e+00 : f32
    %218 = vector.broadcast %cst_150 : f32 to vector<16x128xf32>
    %219 = arith.maximumf %213, %218 : vector<16x128xf32>
    %220 = vector.broadcast %217 : vector<16x1xf32> to vector<16x128xf32>
    %221 = arith.mulf %219, %220 : vector<16x128xf32>
    %c0_151 = arith.constant 0 : index
    %c0_152 = arith.constant 0 : index
    %222 = vector.load %arg56[%c0_151, %c0_152] : memref<16x128xf32, #tpu.memory_space<vmem>>, vector<16x128xf32>
    tpu.vector_store %arg56[%c0_151, %c0_152], %221 {strides = array<i32>} : memref<16x128xf32, #tpu.memory_space<vmem>>, vector<16x128xf32>,
    %c0_153 = arith.constant 0 : index
    %c0_154 = arith.constant 0 : index
    %223 = vector.load %arg50[%c0_153, %c0_154] : memref<8x128xf32, #tpu.memory_space<vmem>>, vector<8x128xf32>
    %cst_155 = arith.constant dense<0.000000e+00> : vector<8x128xf32>
    %224 = tpu.matmul %0, %223, %cst_155 {dimension_numbers = #tpu.dot_dimension_numbers<[1], [0], [0], [1], [0, 0, 1, 1], [], []>} : vector<8x8xf32>, vector<8x128xf32>, vector<8x128xf32> -> vector<8x128xf32>
    %c0_156 = arith.constant 0 : index
    %c0_157 = arith.constant 0 : index
    %225 = vector.load %arg55[%c0_156, %c0_157] : memref<8x128xf32, #tpu.memory_space<vmem>>, vector<8x128xf32>
    %c0_158 = arith.constant 0 : index
    %c0_159 = arith.constant 0 : index
    %226 = vector.load %arg33[%c0_158, %c0_159] : memref<1x8xi32, #tpu.memory_space<vmem>>, vector<1x8xi32>
    %227 = tpu.iota {dimensions = array<i32: 0>} : vector<8x8xi32>
    %228 = vector.broadcast %226 : vector<1x8xi32> to vector<8x8xi32>
    %229 = arith.cmpi eq, %228, %227 : vector<8x8xi32>
    %230 = arith.extui %229 : vector<8x8xi1> to vector<8x8xi32>
    %231 = arith.sitofp %230 : vector<8x8xi32> to vector<8x8xf32>
    %cst_160 = arith.constant dense<0.000000e+00> : vector<8x128xf32>
    %232 = tpu.matmul %231, %225, %cst_160 {dimension_numbers = #tpu.dot_dimension_numbers<[1], [0], [0], [1], [0, 0, 1, 1], [], []>} : vector<8x8xf32>, vector<8x128xf32>, vector<8x128xf32> -> vector<8x128xf32>
    %c0_161 = arith.constant 0 : index
    %c0_162 = arith.constant 0 : index
    %233 = vector.load %arg34[%c0_161, %c0_162] : memref<8x1xf32, #tpu.memory_space<vmem>>, vector<8x1xf32>
    %234 = vector.broadcast %233 : vector<8x1xf32> to vector<8x128xf32>
    %235 = arith.mulf %232, %234 : vector<8x128xf32>
    %c0_163 = arith.constant 0 : index
    %c0_164 = arith.constant 0 : index
    %236 = vector.load %arg40[%c0_163, %c0_164] : memref<128x128xf32, #tpu.memory_space<vmem>>, vector<128x128xf32>
    %cst_165 = arith.constant dense<0.000000e+00> : vector<8x128xf32>
    %237 = tpu.matmul %235, %236, %cst_165 {dimension_numbers = #tpu.dot_dimension_numbers<[1], [0], [0], [1], [0, 0, 1, 1], [], []>} : vector<8x128xf32>, vector<128x128xf32>, vector<8x128xf32> -> vector<8x128xf32>
    %238 = arith.addf %224, %237 : vector<8x128xf32>
    %c0_166 = arith.constant 0 : index
    %c0_167 = arith.constant 0 : index
    %239 = vector.load %arg56[%c0_166, %c0_167] : memref<16x128xf32, #tpu.memory_space<vmem>>, vector<16x128xf32>
    %c0_168 = arith.constant 0 : index
    %c0_169 = arith.constant 0 : index
    %240 = vector.load %arg42[%c0_168, %c0_169] : memref<1x16xi32, #tpu.memory_space<vmem>>, vector<1x16xi32>
    %241 = tpu.iota {dimensions = array<i32: 0>} : vector<8x16xi32>
    %242 = vector.broadcast %240 : vector<1x16xi32> to vector<8x16xi32>
    %243 = arith.cmpi eq, %242, %241 : vector<8x16xi32>
    %244 = arith.extui %243 : vector<8x16xi1> to vector<8x16xi32>
    %245 = arith.sitofp %244 : vector<8x16xi32> to vector<8x16xf32>
    %cst_170 = arith.constant dense<0.000000e+00> : vector<8x128xf32>
    %246 = tpu.matmul %245, %239, %cst_170 {dimension_numbers = #tpu.dot_dimension_numbers<[1], [0], [0], [1], [0, 0, 1, 1], [], []>} : vector<8x16xf32>, vector<16x128xf32>, vector<8x128xf32> -> vector<8x128xf32>
    %c0_171 = arith.constant 0 : index
    %c0_172 = arith.constant 0 : index
    %247 = vector.load %arg43[%c0_171, %c0_172] : memref<8x1xf32, #tpu.memory_space<vmem>>, vector<8x1xf32>
    %248 = vector.broadcast %247 : vector<8x1xf32> to vector<8x128xf32>
    %249 = arith.mulf %246, %248 : vector<8x128xf32>
    %c0_173 = arith.constant 0 : index
    %c0_174 = arith.constant 0 : index
    %250 = vector.load %arg49[%c0_173, %c0_174] : memref<128x128xf32, #tpu.memory_space<vmem>>, vector<128x128xf32>
    %cst_175 = arith.constant dense<0.000000e+00> : vector<8x128xf32>
    %251 = tpu.matmul %249, %250, %cst_175 {dimension_numbers = #tpu.dot_dimension_numbers<[1], [0], [0], [1], [0, 0, 1, 1], [], []>} : vector<8x128xf32>, vector<128x128xf32>, vector<8x128xf32> -> vector<8x128xf32>
    %252 = arith.addf %238, %251 : vector<8x128xf32>
    %c0_176 = arith.constant 0 : index
    %c0_177 = arith.constant 0 : index
    %253 = vector.load %arg51[%c0_176, %c0_177] : memref<1x128xf32, #tpu.memory_space<vmem>>, vector<1x128xf32>
    %254 = vector.broadcast %253 : vector<1x128xf32> to vector<8x128xf32>
    %255 = arith.addf %252, %254 : vector<8x128xf32>
    %cst_178 = arith.constant 0.000000e+00 : f32
    %256 = vector.broadcast %cst_178 : f32 to vector<8x128xf32>
    %257 = arith.maximumf %255, %256 : vector<8x128xf32>
    %c0_179 = arith.constant 0 : index
    %c0_180 = arith.constant 0 : index
    %258 = vector.load %arg57[%c0_179, %c0_180] : memref<8x128xf32, #tpu.memory_space<vmem>>, vector<8x128xf32>
    tpu.vector_store %arg57[%c0_179, %c0_180], %257 {strides = array<i32>} : memref<8x128xf32, #tpu.memory_space<vmem>>, vector<8x128xf32>,
    return
  }
  func.func @transform_0(%arg0: i32) -> (i32, i32) {
    %c0_i32 = arith.constant 0 : i32
    %c0_i32_0 = arith.constant 0 : i32
    %c0_i32_1 = arith.constant 0 : i32
    return %c0_i32, %c0_i32_0 : i32, i32
  }
  func.func @transform_1(%arg0: i32) -> (i32, i32) {
    %c0_i32 = arith.constant 0 : i32
    %c0_i32_0 = arith.constant 0 : i32
    %c0_i32_1 = arith.constant 0 : i32
    return %c0_i32, %c0_i32_0 : i32, i32
  }
  func.func @transform_2(%arg0: i32) -> (i32, i32) {
    %c0_i32 = arith.constant 0 : i32
    %c0_i32_0 = arith.constant 0 : i32
    %c0_i32_1 = arith.constant 0 : i32
    return %c0_i32, %c0_i32_0 : i32, i32
  }
  func.func @transform_3(%arg0: i32) -> (i32, i32) {
    %c0_i32 = arith.constant 0 : i32
    %c0_i32_0 = arith.constant 0 : i32
    %c0_i32_1 = arith.constant 0 : i32
    return %c0_i32, %c0_i32_0 : i32, i32
  }
  func.func @transform_4(%arg0: i32) -> (i32, i32) {
    %c0_i32 = arith.constant 0 : i32
    %c0_i32_0 = arith.constant 0 : i32
    %c0_i32_1 = arith.constant 0 : i32
    return %c0_i32, %c0_i32_0 : i32, i32
  }
  func.func @transform_5(%arg0: i32) -> (i32, i32) {
    %c0_i32 = arith.constant 0 : i32
    %c0_i32_0 = arith.constant 0 : i32
    %c0_i32_1 = arith.constant 0 : i32
    return %c0_i32, %c0_i32_0 : i32, i32
  }
  func.func @transform_6(%arg0: i32) -> (i32, i32) {
    %c0_i32 = arith.constant 0 : i32
    %c0_i32_0 = arith.constant 0 : i32
    %c0_i32_1 = arith.constant 0 : i32
    return %c0_i32, %c0_i32_0 : i32, i32
  }
  func.func @transform_7(%arg0: i32) -> (i32, i32) {
    %c0_i32 = arith.constant 0 : i32
    %c0_i32_0 = arith.constant 0 : i32
    %c0_i32_1 = arith.constant 0 : i32
    return %c0_i32, %c0_i32_0 : i32, i32
  }
  func.func @transform_8(%arg0: i32) -> (i32, i32) {
    %c0_i32 = arith.constant 0 : i32
    %c0_i32_0 = arith.constant 0 : i32
    %c0_i32_1 = arith.constant 0 : i32
    return %c0_i32, %c0_i32_0 : i32, i32
  }
  func.func @transform_9(%arg0: i32) -> (i32, i32) {
    %c0_i32 = arith.constant 0 : i32
    %c0_i32_0 = arith.constant 0 : i32
    %c0_i32_1 = arith.constant 0 : i32
    return %c0_i32, %c0_i32_0 : i32, i32
  }
  func.func @transform_10(%arg0: i32) -> (i32, i32) {
    %c0_i32 = arith.constant 0 : i32
    %c0_i32_0 = arith.constant 0 : i32
    %c0_i32_1 = arith.constant 0 : i32
    return %c0_i32, %c0_i32_0 : i32, i32
  }
  func.func @transform_11(%arg0: i32) -> (i32, i32) {
    %c0_i32 = arith.constant 0 : i32
    %c0_i32_0 = arith.constant 0 : i32
    %c0_i32_1 = arith.constant 0 : i32
    return %c0_i32, %c0_i32_0 : i32, i32
  }
  func.func @transform_12(%arg0: i32) -> (i32, i32) {
    %c0_i32 = arith.constant 0 : i32
    %c0_i32_0 = arith.constant 0 : i32
    %c0_i32_1 = arith.constant 0 : i32
    return %c0_i32, %c0_i32_0 : i32, i32
  }
  func.func @transform_13(%arg0: i32) -> (i32, i32) {
    %c0_i32 = arith.constant 0 : i32
    %c0_i32_0 = arith.constant 0 : i32
    %c0_i32_1 = arith.constant 0 : i32
    return %c0_i32, %c0_i32_0 : i32, i32
  }
  func.func @transform_14(%arg0: i32) -> (i32, i32) {
    %c0_i32 = arith.constant 0 : i32
    %c0_i32_0 = arith.constant 0 : i32
    %c0_i32_1 = arith.constant 0 : i32
    return %c0_i32, %c0_i32_0 : i32, i32
  }
  func.func @transform_15(%arg0: i32) -> (i32, i32) {
    %c0_i32 = arith.constant 0 : i32
    %c0_i32_0 = arith.constant 0 : i32
    %c0_i32_1 = arith.constant 0 : i32
    return %c0_i32, %c0_i32_0 : i32, i32
  }
  func.func @transform_16(%arg0: i32) -> (i32, i32) {
    %c0_i32 = arith.constant 0 : i32
    %c0_i32_0 = arith.constant 0 : i32
    %c0_i32_1 = arith.constant 0 : i32
    return %c0_i32, %c0_i32_0 : i32, i32
  }
  func.func @transform_17(%arg0: i32) -> (i32, i32) {
    %c0_i32 = arith.constant 0 : i32
    %c0_i32_0 = arith.constant 0 : i32
    %c0_i32_1 = arith.constant 0 : i32
    return %c0_i32, %c0_i32_0 : i32, i32
  }
  func.func @transform_18(%arg0: i32) -> (i32, i32) {
    %c0_i32 = arith.constant 0 : i32
    %c0_i32_0 = arith.constant 0 : i32
    %c0_i32_1 = arith.constant 0 : i32
    return %c0_i32, %c0_i32_0 : i32, i32
  }
  func.func @transform_19(%arg0: i32) -> (i32, i32) {
    %c0_i32 = arith.constant 0 : i32
    %c0_i32_0 = arith.constant 0 : i32
    %c0_i32_1 = arith.constant 0 : i32
    return %c0_i32, %c0_i32_0 : i32, i32
  }
  func.func @transform_20(%arg0: i32) -> (i32, i32) {
    %c0_i32 = arith.constant 0 : i32
    %c0_i32_0 = arith.constant 0 : i32
    %c0_i32_1 = arith.constant 0 : i32
    return %c0_i32, %c0_i32_0 : i32, i32
  }
  func.func @transform_21(%arg0: i32) -> (i32, i32) {
    %c0_i32 = arith.constant 0 : i32
    %c0_i32_0 = arith.constant 0 : i32
    %c0_i32_1 = arith.constant 0 : i32
    return %c0_i32, %c0_i32_0 : i32, i32
  }
  func.func @transform_22(%arg0: i32) -> (i32, i32) {
    %c0_i32 = arith.constant 0 : i32
    %c0_i32_0 = arith.constant 0 : i32
    %c0_i32_1 = arith.constant 0 : i32
    return %c0_i32, %c0_i32_0 : i32, i32
  }
  func.func @transform_23(%arg0: i32) -> (i32, i32) {
    %c0_i32 = arith.constant 0 : i32
    %c0_i32_0 = arith.constant 0 : i32
    %c0_i32_1 = arith.constant 0 : i32
    return %c0_i32, %c0_i32_0 : i32, i32
  }
  func.func @transform_24(%arg0: i32) -> (i32, i32) {
    %c0_i32 = arith.constant 0 : i32
    %c0_i32_0 = arith.constant 0 : i32
    %c0_i32_1 = arith.constant 0 : i32
    return %c0_i32, %c0_i32_0 : i32, i32
  }
  func.func @transform_25(%arg0: i32) -> (i32, i32) {
    %c0_i32 = arith.constant 0 : i32
    %c0_i32_0 = arith.constant 0 : i32
    %c0_i32_1 = arith.constant 0 : i32
    return %c0_i32, %c0_i32_0 : i32, i32
  }
  func.func @transform_26(%arg0: i32) -> (i32, i32) {
    %c0_i32 = arith.constant 0 : i32
    %c0_i32_0 = arith.constant 0 : i32
    %c0_i32_1 = arith.constant 0 : i32
    return %c0_i32, %c0_i32_0 : i32, i32
  }
  func.func @transform_27(%arg0: i32) -> (i32, i32) {
    %c0_i32 = arith.constant 0 : i32
    %c0_i32_0 = arith.constant 0 : i32
    %c0_i32_1 = arith.constant 0 : i32
    return %c0_i32, %c0_i32_0 : i32, i32
  }
  func.func @transform_28(%arg0: i32) -> (i32, i32) {
    %c0_i32 = arith.constant 0 : i32
    %c0_i32_0 = arith.constant 0 : i32
    %c0_i32_1 = arith.constant 0 : i32
    return %c0_i32, %c0_i32_0 : i32, i32
  }
  func.func @transform_29(%arg0: i32) -> (i32, i32) {
    %c0_i32 = arith.constant 0 : i32
    %c0_i32_0 = arith.constant 0 : i32
    %c0_i32_1 = arith.constant 0 : i32
    return %c0_i32, %c0_i32_0 : i32, i32
  }
  func.func @transform_30(%arg0: i32) -> (i32, i32) {
    %c0_i32 = arith.constant 0 : i32
    %c0_i32_0 = arith.constant 0 : i32
    %c0_i32_1 = arith.constant 0 : i32
    return %c0_i32, %c0_i32_0 : i32, i32
  }
  func.func @transform_31(%arg0: i32) -> (i32, i32) {
    %c0_i32 = arith.constant 0 : i32
    %c0_i32_0 = arith.constant 0 : i32
    %c0_i32_1 = arith.constant 0 : i32
    return %c0_i32, %c0_i32_0 : i32, i32
  }
  func.func @transform_32(%arg0: i32) -> (i32, i32) {
    %c0_i32 = arith.constant 0 : i32
    %c0_i32_0 = arith.constant 0 : i32
    %c0_i32_1 = arith.constant 0 : i32
    return %c0_i32, %c0_i32_0 : i32, i32
  }
  func.func @transform_33(%arg0: i32) -> (i32, i32) {
    %c0_i32 = arith.constant 0 : i32
    %c0_i32_0 = arith.constant 0 : i32
    %c0_i32_1 = arith.constant 0 : i32
    return %c0_i32, %c0_i32_0 : i32, i32
  }
  func.func @transform_34(%arg0: i32) -> (i32, i32) {
    %c0_i32 = arith.constant 0 : i32
    %c0_i32_0 = arith.constant 0 : i32
    %c0_i32_1 = arith.constant 0 : i32
    return %c0_i32, %c0_i32_0 : i32, i32
  }
  func.func @transform_35(%arg0: i32) -> (i32, i32) {
    %c0_i32 = arith.constant 0 : i32
    %c0_i32_0 = arith.constant 0 : i32
    %c0_i32_1 = arith.constant 0 : i32
    return %c0_i32, %c0_i32_0 : i32, i32
  }
  func.func @transform_36(%arg0: i32) -> (i32, i32) {
    %c0_i32 = arith.constant 0 : i32
    %c0_i32_0 = arith.constant 0 : i32
    %c0_i32_1 = arith.constant 0 : i32
    return %c0_i32, %c0_i32_0 : i32, i32
  }
  func.func @transform_37(%arg0: i32) -> (i32, i32) {
    %c0_i32 = arith.constant 0 : i32
    %c0_i32_0 = arith.constant 0 : i32
    %c0_i32_1 = arith.constant 0 : i32
    return %c0_i32, %c0_i32_0 : i32, i32
  }
  func.func @transform_38(%arg0: i32) -> (i32, i32) {
    %c0_i32 = arith.constant 0 : i32
    %c0_i32_0 = arith.constant 0 : i32
    %c0_i32_1 = arith.constant 0 : i32
    return %c0_i32, %c0_i32_0 : i32, i32
  }
  func.func @transform_39(%arg0: i32) -> (i32, i32) {
    %c0_i32 = arith.constant 0 : i32
    %c0_i32_0 = arith.constant 0 : i32
    %c0_i32_1 = arith.constant 0 : i32
    return %c0_i32, %c0_i32_0 : i32, i32
  }
  func.func @transform_40(%arg0: i32) -> (i32, i32) {
    %c0_i32 = arith.constant 0 : i32
    %c0_i32_0 = arith.constant 0 : i32
    %c0_i32_1 = arith.constant 0 : i32
    return %c0_i32, %c0_i32_0 : i32, i32
  }
  func.func @transform_41(%arg0: i32) -> (i32, i32) {
    %c0_i32 = arith.constant 0 : i32
    %c0_i32_0 = arith.constant 0 : i32
    %c0_i32_1 = arith.constant 0 : i32
    return %c0_i32, %c0_i32_0 : i32, i32
  }
  func.func @transform_42(%arg0: i32) -> (i32, i32) {
    %c0_i32 = arith.constant 0 : i32
    %c0_i32_0 = arith.constant 0 : i32
    %c0_i32_1 = arith.constant 0 : i32
    return %c0_i32, %c0_i32_0 : i32, i32
  }
  func.func @transform_43(%arg0: i32) -> (i32, i32) {
    %c0_i32 = arith.constant 0 : i32
    %c0_i32_0 = arith.constant 0 : i32
    %c0_i32_1 = arith.constant 0 : i32
    return %c0_i32, %c0_i32_0 : i32, i32
  }
  func.func @transform_44(%arg0: i32) -> (i32, i32) {
    %c0_i32 = arith.constant 0 : i32
    %c0_i32_0 = arith.constant 0 : i32
    %c0_i32_1 = arith.constant 0 : i32
    return %c0_i32, %c0_i32_0 : i32, i32
  }
  func.func @transform_45(%arg0: i32) -> (i32, i32) {
    %c0_i32 = arith.constant 0 : i32
    %c0_i32_0 = arith.constant 0 : i32
    %c0_i32_1 = arith.constant 0 : i32
    return %c0_i32, %c0_i32_0 : i32, i32
  }
  func.func @transform_46(%arg0: i32) -> (i32, i32) {
    %c0_i32 = arith.constant 0 : i32
    %c0_i32_0 = arith.constant 0 : i32
    %c0_i32_1 = arith.constant 0 : i32
    return %c0_i32, %c0_i32_0 : i32, i32
  }
  func.func @transform_47(%arg0: i32) -> (i32, i32) {
    %c0_i32 = arith.constant 0 : i32
    %c0_i32_0 = arith.constant 0 : i32
    %c0_i32_1 = arith.constant 0 : i32
    return %c0_i32, %c0_i32_0 : i32, i32
  }
  func.func @transform_48(%arg0: i32) -> (i32, i32) {
    %c0_i32 = arith.constant 0 : i32
    %c0_i32_0 = arith.constant 0 : i32
    %c0_i32_1 = arith.constant 0 : i32
    return %c0_i32, %c0_i32_0 : i32, i32
  }
  func.func @transform_49(%arg0: i32) -> (i32, i32) {
    %c0_i32 = arith.constant 0 : i32
    %c0_i32_0 = arith.constant 0 : i32
    %c0_i32_1 = arith.constant 0 : i32
    return %c0_i32, %c0_i32_0 : i32, i32
  }
  func.func @transform_50(%arg0: i32) -> (i32, i32) {
    %c0_i32 = arith.constant 0 : i32
    %c0_i32_0 = arith.constant 0 : i32
    %c0_i32_1 = arith.constant 0 : i32
    return %c0_i32, %c0_i32_0 : i32, i32
  }
  func.func @transform_51(%arg0: i32) -> (i32, i32) {
    %c0_i32 = arith.constant 0 : i32
    %c0_i32_0 = arith.constant 0 : i32
    %c0_i32_1 = arith.constant 0 : i32
    return %c0_i32, %c0_i32_0 : i32, i32
  }
  func.func @transform_52(%arg0: i32) -> (i32, i32) {
    %c0_i32 = arith.constant 0 : i32
    %c0_i32_0 = arith.constant 0 : i32
    %c0_i32_1 = arith.constant 0 : i32
    return %c0_i32, %c0_i32_0 : i32, i32
  }
  func.func @transform_53(%arg0: i32) -> (i32, i32) {
    %c0_i32 = arith.constant 0 : i32
    %c0_i32_0 = arith.constant 0 : i32
    %c0_i32_1 = arith.constant 0 : i32
    return %c0_i32, %c0_i32_0 : i32, i32
  }
  func.func @transform_54(%arg0: i32) -> (i32, i32) {
    %c0_i32 = arith.constant 0 : i32
    %c0_i32_0 = arith.constant 0 : i32
    %c0_i32_1 = arith.constant 0 : i32
    return %c0_i32, %c0_i32_0 : i32, i32
  }
  func.func @transform_55(%arg0: i32) -> (i32, i32) {
    %c0_i32 = arith.constant 0 : i32
    %c0_i32_0 = arith.constant 0 : i32
    %c0_i32_1 = arith.constant 0 : i32
    return %c0_i32, %c0_i32_0 : i32, i32
  }
  func.func @transform_56(%arg0: i32) -> (i32, i32) {
    %c0_i32 = arith.constant 0 : i32
    %c0_i32_0 = arith.constant 0 : i32
    %c0_i32_1 = arith.constant 0 : i32
    return %c0_i32, %c0_i32_0 : i32, i32
  }
}

</mosaic_0001>

<bundles_post_ra>
// kernel: _lambda_.1
= control target key start
LH: loop header
LB: loop body
LE: loop exit
PB: predicated region body
PF: predicated region fallthrough
CT: control target
= control target key end

     0   :  { %s4893_s6 = smov 1   ;;  %s4894_s10 = smov 2   ;;  %s5680_s0 = inlined_call_operand.smem [shape: u32[57], index: -1, kind: input, shape index: {}] }
   0x1   :  { %s4968_s5 = sld [smem:[%s5680_s0]]   ;;  %s4895_s14 = smov 3  }
   0x2   :  { %s4973_s9 = sld [smem:[%s5680_s0 + %s4893_s6]]   ;;  %s4896_s18 = smov 4  }
   0x3   :  { %s4978_s13 = sld [smem:[%s5680_s0 + %s4894_s10]]   ;;  %s4897_s22 = smov 5  }
   0x4   :  { %s4983_s17 = sld [smem:[%s5680_s0 + %s4895_s14]]   ;;  %s4898_s26 = smov 6  }
   0x5   :  { %s4988_s21 = sld [smem:[%s5680_s0 + %s4896_s18]]   ;;  %s4899_s30 = smov 7  }
   0x6   :  { %s4993_s25 = sld [smem:[%s5680_s0 + %s4897_s22]]   ;;  %s4900_s4 = smov 8  }
   0x7   :  { %s4998_s29 = sld [smem:[%s5680_s0 + %s4898_s26]]   ;;  %s4901_s10 = smov 9  }
   0x8   :  { %s5003_s3 = sld [smem:[%s5680_s0 + %s4899_s30]]   ;;  %s4902_s15 = smov 10  }
   0x9   :  { %s5008_s8 = sld [smem:[%s5680_s0 + %s4900_s4]]   ;;  %s4903_s20 = smov 11  }
   0xa   :  { %5701 = sst [smem:[#allocation13_spill]] %s4983_s17  ;;  %s4904_s26 = smov 12  }
   0xb   :  { %s5013_s14 = sld [smem:[%s5680_s0 + %s4901_s10]]   ;;  %s4905_s1 = smov 13  }
   0xc   :  { %5702 = sst [smem:[#allocation14_spill]] %s4993_s25  ;;  %s4906_s7 = smov 14  }
   0xd   :  { %5703 = sst [smem:[#allocation15_spill]] %s4998_s29  ;;  %s4908_s22 = smov 16  }
   0xe   :  { %5704 = sst [smem:[#allocation16_spill]] %s5003_s3  ;;  %s4909_s28 = smov 17  }
   0xf   :  { %5705 = sst [smem:[#allocation17_spill]] %s5008_s8 }
  0x10   :  { %s5018_s19 = sld [smem:[%s5680_s0 + %s4902_s15]]   ;;  %s4907_s15 = smov 15  }
  0x11   :  { %5706 = sst [smem:[#allocation18_spill]] %s5013_s14 }
  0x12   :  { %s5023_s24 = sld [smem:[%s5680_s0 + %s4903_s20]]  }
  0x13   :  { %s5028_s30 = sld [smem:[%s5680_s0 + %s4904_s26]]  }
  0x14   :  { %s5033_s6 = sld [smem:[%s5680_s0 + %s4905_s1]]  }
  0x15   :  { %s5038_s12 = sld [smem:[%s5680_s0 + %s4906_s7]]   ;;  %s4910_s7 = smov 18  }
  0x16   :  { %5707 = sst [smem:[#allocation19_spill]] %s5018_s19 }
  0x17   :  { %s5043_s20 = sld [smem:[%s5680_s0 + %s4907_s15]]   ;;  %s4911_s15 = smov 19  }
  0x18   :  { %s5048_s27 = sld [smem:[%s5680_s0 + %s4908_s22]]   ;;  %s4912_s22 = smov 20  }
  0x19   :  { %s5053_s4 = sld [smem:[%s5680_s0 + %s4909_s28]]   ;;  %s4913_s28 = smov 21  }
  0x1a   :  { %5708 = sst [smem:[#allocation20_spill]] %s5033_s6 }
  0x1b   :  { %s5058_s17 = sld [smem:[%s5680_s0 + %s4910_s7]]   ;;  %s4914_s7 = smov 22  }
  0x1c   :  { %s5063_s6 = sld [smem:[%s5680_s0 + %s4911_s15]]   ;;  %s4915_s15 = smov 23  }
  0x1d   :  { %5709 = sst [smem:[#allocation21_spill]] %s5043_s20 }
  0x1e   :  { %5710 = sst [smem:[#allocation22_spill]] %s5048_s27 }
  0x1f   :  { %5711 = sst [smem:[#allocation23_spill]] %s5053_s4 }
  0x20   :  { %s5068_s20 = sld [smem:[%s5680_s0 + %s4912_s22]]   ;;  %s4916_s22 = smov 24  }
  0x21   :  { %5712 = sst [smem:[#allocation24_spill]] %s5058_s17 }
  0x22   :  { %5713 = sst [smem:[#allocation25_spill]] %s5063_s6 }
  0x23   :  { %s5073_s19 = sld [smem:[%s5680_s0 + %s4913_s28]]   ;;  %s4917_s28 = smov 25  }
  0x24   :  { %s5078_s17 = sld [smem:[%s5680_s0 + %s4914_s7]]   ;;  %s4918_s7 = smov 26  }
  0x25   :  { %s5083_s6 = sld [smem:[%s5680_s0 + %s4915_s15]]   ;;  %s4919_s15 = smov 27  }
  0x26   :  { %5714 = sst [smem:[#allocation26_spill]] %s5068_s20 }
  0x27   :  { %s5088_s20 = sld [smem:[%s5680_s0 + %s4916_s22]]   ;;  %s4920_s22 = smov 28  }
  0x28   :  { %s5093_s27 = sld [smem:[%s5680_s0 + %s4917_s28]]   ;;  %s4921_s28 = smov 29  }
  0x29   :  { %s5098_s4 = sld [smem:[%s5680_s0 + %s4918_s7]]   ;;  %s4922_s7 = smov 30  }
  0x2a   :  { %s5108_s14 = sld [smem:[%s5680_s0 + %s4920_s22]]   ;;  %s4924_s22 = smov 32  }
  0x2b   :  { %5715 = sst [smem:[#allocation27_spill]] %s5083_s6 }
  0x2c   :  { %s5103_s6 = sld [smem:[%s5680_s0 + %s4919_s15]]   ;;  %s4923_s15 = smov 31  }
  0x2e   :  { %5716 = sst [smem:[#allocation28_spill]] %s5093_s27 }
  0x2f   :  { %5717 = sst [smem:[#allocation29_spill]] %s5098_s4 }
  0x30   :  { %5719 = sst [smem:[#allocation31_spill]] %s5108_s14 }
  0x31   :  { %s5113_s27 = sld [smem:[%s5680_s0 + %s4921_s28]]   ;;  %s4925_s28 = smov 33  }
  0x32   :  { %5718 = sst [smem:[#allocation30_spill]] %s5103_s6 }
  0x33   :  { %s5118_s4 = sld [smem:[%s5680_s0 + %s4922_s7]]   ;;  %s4926_s7 = smov 34  }
  0x34   :  { %s5123_s6 = sld [smem:[%s5680_s0 + %s4923_s15]]   ;;  %s4927_s15 = smov 35  }
  0x35   :  { %s5128_s14 = sld [smem:[%s5680_s0 + %s4924_s22]]   ;;  %s4928_s22 = smov 36  }
  0x36   :  { %s5143_s29 = sld [smem:[%s5680_s0 + %s4927_s15]]   ;;  %s4931_s15 = smov 39  }
  0x37   :  { %5720 = sst [smem:[#allocation32_spill]] %s5113_s27 }
  0x38   :  { %s5133_s27 = sld [smem:[%s5680_s0 + %s4925_s28]]   ;;  %s4929_s28 = smov 37  }
  0x39   :  { %5721 = sst [smem:[#allocation33_spill]] %s5118_s4 }
  0x3a   :  { %s5138_s4 = sld [smem:[%s5680_s0 + %s4926_s7]]   ;;  %s4930_s7 = smov 38  }
  0x3b   :  { %5722 = sst [smem:[#allocation34_spill]] %s5128_s14 }
  0x3c   :  { %5724 = sst [smem:[#allocation36_spill]] %s5143_s29 }
  0x3d   :  { %s5148_s14 = sld [smem:[%s5680_s0 + %s4928_s22]]   ;;  %s4932_s22 = smov 40  }
  0x3e   :  { %5723 = sst [smem:[#allocation35_spill]] %s5133_s27 }
  0x3f   :  { %s5153_s25 = sld [smem:[%s5680_s0 + %s4929_s28]]   ;;  %s4933_s28 = smov 41  }
  0x40   :  { %s5158_s3 = sld [smem:[%s5680_s0 + %s4930_s7]]   ;;  %s4934_s7 = smov 42  }
  0x41   :  { %s5163_s29 = sld [smem:[%s5680_s0 + %s4931_s15]]   ;;  %s4935_s15 = smov 43  }
  0x43   :  { %5725 = sst [smem:[#allocation37_spill]] %s5148_s14 }
  0x44   :  { %s5168_s14 = sld [smem:[%s5680_s0 + %s4932_s22]]   ;;  %s4936_s22 = smov 44  }
  0x45   :  { %5726 = sst [smem:[#allocation38_spill]] %s5153_s25 }
  0x46   :  { %5727 = sst [smem:[#allocation39_spill]] %s5158_s3 }
  0x47   :  { %5728 = sst [smem:[#allocation40_spill]] %s5163_s29 }
  0x48   :  { %s5173_s25 = sld [smem:[%s5680_s0 + %s4933_s28]]   ;;  %s4937_s28 = smov 45  }
  0x49   :  { %s5178_s3 = sld [smem:[%s5680_s0 + %s4934_s7]]   ;;  %s4938_s7 = smov 46  }
  0x4a   :  { %s5183_s29 = sld [smem:[%s5680_s0 + %s4935_s15]]   ;;  %s4939_s15 = smov 47  }
  0x4b   :  { %s5188_s8 = sld [smem:[%s5680_s0 + %s4936_s22]]   ;;  %s4940_s22 = smov 48  }
  0x4c   :  { %s5203_s27 = sld [smem:[%s5680_s0 + %s4939_s15]]   ;;  %s4943_s15 = smov 51  }
  0x4e   :  { %5729 = sst [smem:[#allocation41_spill]] %s5173_s25 }
  0x4f   :  { %5730 = sst [smem:[#allocation42_spill]] %s5178_s3 }
  0x50   :  { %s5193_s25 = sld [smem:[%s5680_s0 + %s4937_s28]]   ;;  %s4941_s28 = smov 49  }
  0x51   :  { %5731 = sst [smem:[#allocation43_spill]] %s5188_s8 }
  0x52   :  { %s5198_s3 = sld [smem:[%s5680_s0 + %s4938_s7]]   ;;  %s4942_s7 = smov 50  }
  0x53   :  { %5734 = sst [smem:[#allocation46_spill]] %s5203_s27 }
  0x54   :  { %s5208_s8 = sld [smem:[%s5680_s0 + %s4940_s22]]   ;;  %s4944_s22 = smov 52  }
  0x55   :  { %s5223_s27 = sld [smem:[%s5680_s0 + %s4943_s15]]   ;;  %s4947_s15 = smov 55  }
  0x56   :  { %5732 = sst [smem:[#allocation44_spill]] %s5193_s25 }
  0x57   :  { %s5213_s25 = sld [smem:[%s5680_s0 + %s4941_s28]]   ;;  %s4945_s28 = smov 53  }
  0x58   :  { %5733 = sst [smem:[#allocation45_spill]] %s5198_s3 }
  0x59   :  { %s5218_s3 = sld [smem:[%s5680_s0 + %s4942_s7]]   ;;  %s4946_s7 = smov 54  }
  0x5a   :  { %5735 = sst [smem:[#allocation47_spill]] %s5208_s8 }
  0x5b   :  { %5738 = sst [smem:[#allocation50_spill]] %s5223_s27 }
  0x5c   :  { %s5228_s8 = sld [smem:[%s5680_s0 + %s4944_s22]]   ;;  %s4948_s22 = smov 56  }
  0x5d   :  { %5736 = sst [smem:[#allocation48_spill]] %s5213_s25 }
  0x5e   :  { %s5233_s25 = sld [smem:[%s5680_s0 + %s4945_s28]]  }
  0x5f   :  { %5737 = sst [smem:[#allocation49_spill]] %s5218_s3 }
  0x60   :  { %s5238_s3 = sld [smem:[%s5680_s0 + %s4946_s7]]  }
  0x61   :  { %s5243_s27 = sld [smem:[%s5680_s0 + %s4947_s15]]  }
  0x62   :  { %5739 = sst [smem:[#allocation51_spill]] %s5228_s8 }
  0x63   :  { %s5248_s8 = sld [smem:[%s5680_s0 + %s4948_s22]]  }
  0x64   :  { %119 = vsyncpa [#allocation3], 0 }
  0x65   :  { %120 = vsyncpa [#allocation5], 0  ;;  %v227_v0 = vld [vmem:[%s4978_s13] sm:$0xff]  ;;  %v4949_v2 = vmov 0   ;;  %v228_v3 = vld [vmem:[%s4978_s13 + $0x8] sm:$0xff] }
  0x66   :  { %v225_v1 = vld [vmem:[%s4973_s9] sm:$0xff]  ;;  %4753 = vset.pattern.permute.xlu1 %v4949_v2  ;;  %4752 = vset.pattern.permute.xlu0 %v4949_v2  ;;  %v226_v4 = vld [vmem:[%s4973_s9 + $0x8] sm:$0xff] }
  0x67   :  { %246 = vperm.xlu0 %4752, %v227_v0   ;;  %234 = vperm.xlu1 %4753, %v225_v1   ;;  %v229_v5 = vld [vmem:[%s4988_s21] sm:$0xff]  ;;  %v230_v6 = vld [vmem:[%s4988_s21 + $0x8] sm:$0xff] }
  0x68   :  { %v352_v7 = vld [vmem:[%s5183_s29] sm:$0xff]  ;;  %v353_v8 = vld [vmem:[%s5183_s29 + $0x8] sm:$0xff] }
  0x69   :  { %v5259_v9 = vld [vmem:[%s5138_s4] sm:$0xff]  ;;  %v5261_v10 = vpack.c.bf16 %v353_v8, %v352_v7 }
  0x6a   :  { %4084 = vmatprep.subr.mxu0 %v5259_v9 }
  0x6b   :  { %249 = vperm.xlu0 %4752, %v228_v3   ;;  %237 = vperm.xlu1 %4753, %v226_v4  }
  0x6c   :  { %121 = vsyncpa [#allocation8], 0  ;;  %v5265_v11 = vld [vmem:[%s4968_s5] sm:$0xff]  ;;  %v891_v13 = vld [vmem:[%s5023_s24 + $0x8] sm:$0xff]  ;;  %4458 = vmatprep.subr.bf16.mxu1 %v5261_v10  ;;  %4085 = vmatpush3.msra.mxu0 %v5259_v9  ;;  %v4950_v22 = vmov 0.0   ;;  %vm868_vm2 = vcmp.ge.s32.totalorder %v225_v1, 0  ;;  %v231_v46 = vlaneseq }
  0x6d   :  { %v890_v12 = vld [vmem:[%s5023_s24] sm:$0xff]  ;;  %4460 = vmatpush3.bf16.msra.mxu1 %v5261_v10  ;;  %4096 = vmatprep.subr.mxu0 %v5265_v11  ;;  %v893_v15 = vld [vmem:[%s5028_s30 + $0x8] sm:$0xff]  ;;  %vm1529_vm1 = vcmp.ge.s32.totalorder %v891_v13, 0  ;;  %vm869_vm3 = vcmp.ge.s32.totalorder %v226_v4, 0  ;;  %v3803_v28 = vsel %vm868_vm2, 1.0, %v4950_v22  ;;  %s5740_s0 = sld [smem:[#allocation35_spill]] }
  0x6e   :  { %v892_v14 = vld [vmem:[%s5028_s30] sm:$0xff]  ;;  %v895_v17 = vld [vmem:[%s5038_s12 + $0x8] sm:$0xff]  ;;  %vm1528_vm0 = vcmp.ge.s32.totalorder %v890_v12, 0  ;;  %v3827_v24 = vsel %vm1529_vm1, 1.0, %v4950_v22  ;;  %v3804_v29 = vsel %vm869_vm3, 1.0, %v4950_v22  ;;  %s5741_s9 = sld [smem:[#allocation42_spill]] }
  0x6f   :  { %258 = vperm.xlu0 %4752, %v229_v5   ;;  %261 = vperm.xlu1 %4753, %v230_v6   ;;  %v894_v16 = vld [vmem:[%s5038_s12] sm:$0xff]  ;;  %v1551_v19 = vld [vmem:[%s5073_s19 + $0x8] sm:$0xff]  ;;  %v3826_v23 = vsel %vm1528_vm0, 1.0, %v4950_v22  ;;  %v4764_v36 = vpack.i.bf16 %v3804_v29, %v3803_v28  ;;  %s5742_s13 = sld [smem:[#allocation17_spill]]  ;;  %v5300_v47 = vand.u32 127, %v231_v46  ;;  %vm354_vm9 = vcmask 130048  }
  0x70   :  { %v1550_v18 = vld [vmem:[%s5073_s19] sm:$0xff]  ;;  %v1553_v21 = vld [vmem:[%s5078_s17 + $0x8] sm:$0xff]  ;;  %vm2189_vm5 = vcmp.ge.s32.totalorder %v1551_v19, 0  ;;  %v4754_v27 = vpack.i.bf16 %v3827_v24, %v3826_v23  ;;  %vm270_vm10 = vcmask 64512   ;;  %s5744_s21 = sld [smem:[#allocation14_spill]]  ;;  %s5746_s19 = sld [smem:[#allocation18_spill]] }
  0x71   :  { %v1552_v20 = vld [vmem:[%s5078_s17] sm:$0xff]  ;;  %v1555_v26 = vld [vmem:[%s5088_s20 + $0x8] sm:$0xff]  ;;  %vm2188_vm4 = vcmp.ge.s32.totalorder %v1550_v18, 0  ;;  %v3850_v31 = vsel %vm2189_vm5, 1.0, %v4950_v22  ;;  %s5743_s17 = sld [smem:[#allocation16_spill]]  ;;  %vm525_vm1 = vcmask 261120  }
  0x72   :  { %v1554_v25 = vld [vmem:[%s5088_s20] sm:$0xff]  ;;  %v3849_v30 = vsel %vm2188_vm4, 1.0, %v4950_v22  ;;  %v3001_v34 = vld [vmem:[%s5168_s14 + $0x8] sm:$0xff]  ;;  %s5747_s24 = sld [smem:[#allocation30_spill]]  ;;  %s5748_s30 = sld [smem:[#allocation23_spill]] }
  0x73   :  { %897 = vperm.xlu0 %4752, %v890_v12   ;;  %900 = vperm.xlu1 %4753, %v891_v13   ;;  %v2459_v32 = vld [vmem:[%s5123_s6] sm:$0xff]  ;;  %v4759_v35 = vpack.i.bf16 %v3850_v31, %v3849_v30  ;;  %vm3189_vm7 = vcmp.ge.s32.totalorder %v3001_v34, 0  ;;  %s5749_s6 = sld [smem:[#allocation29_spill]]  ;;  %s5750_s12 = sld [smem:[#allocation22_spill]] }
  0x74   :  { %v3000_v33 = vld [vmem:[%s5168_s14] sm:$0xff]  ;;  %v3880_v38 = vsel %vm3189_vm7, 1.0, %v4950_v22  ;;  %vm2622_vm8 = vcmp.ge.s32.totalorder %v2459_v32, 0  ;;  %s5745_s14 = sld [smem:[#allocation15_spill]]  ;;  %s5751_s20 = sld [smem:[#allocation19_spill]] }
  0x75   :  { %vm3188_vm6 = vcmp.ge.s32.totalorder %v3000_v33, 0  ;;  %v3859_v40 = vsel %vm2622_vm8, 1.0, %v4950_v22  ;;  %v3293_v41 = vld [vmem:[%s5740_s0] sm:$0xff]  ;;  %v691_v44 = vld [vmem:[%s5742_s13 + $0x8] sm:$0xff]  ;;  %s5752_s4 = sld [smem:[#allocation31_spill]]  ;;  %s5753_s28 = sld [smem:[#allocation24_spill]] }
  0x76   :  { %v3879_v37 = vsel %vm3188_vm6, 1.0, %v4950_v22  ;;  %v3542_v42 = vld [vmem:[%s5741_s9] sm:$0xff]  ;;  %v689_v3 = vld [vmem:[%s5744_s21 + $0x8] sm:$0xff]  ;;  %s5754_s1 = sld [smem:[#allocation28_spill]]  ;;  %s5755_s2 = sld [smem:[#allocation32_spill]] }
  0x77   :  { %909 = vperm.xlu0 %4752, %v892_v14   ;;  %912 = vperm.xlu1 %4753, %v893_v15   ;;  %v4769_v39 = vpack.i.bf16 %v3880_v38, %v3879_v37  ;;  %v690_v43 = vld [vmem:[%s5742_s13] sm:$0xff]  ;;  %v522_v53 = vld [vmem:[%s5743_s17 + $0x8] sm:$0xff]  ;;  %v523_v60 = vld [vmem:[%s5743_s17 + $0x10] sm:$0xff]  ;;  %s5756_s7 = sld [smem:[#allocation21_spill]]  ;;  %s5757_s10 = sld [smem:[#allocation25_spill]] }
  0x78   :  { %v4477_v45 = vpack.c.bf16 %v691_v44, %v690_v43  ;;  %v521_v52 = vld [vmem:[%s5743_s17] sm:$0xff]  ;;  %v524_v61 = vld [vmem:[%s5743_s17 + $0x18] sm:$0xff]  ;;  %s5758_s11 = sld [smem:[#allocation37_spill]]  ;;  %s5759_s15 = sld [smem:[#allocation38_spill]] }
  0x79   :  { %v4461_v56 = vpack.c.bf16 %v522_v53, %v521_v52  ;;  %v688_v59 = vld [vmem:[%s5744_s21] sm:$0xff]  ;;  %v4465_v2 = vpack.c.bf16 %v524_v61, %v523_v60  ;;  %v1844_v52 = vld [vmem:[%s5747_s24 + $0x10] sm:$0xff]  ;;  %v1845_v53 = vld [vmem:[%s5747_s24 + $0x18] sm:$0xff]  ;;  %s5760_s16 = sld [smem:[#allocation33_spill]]  ;;  %s5761_s18 = sld [smem:[#allocation26_spill]] }
  0x7a   :  { %4478 = vmatprep.subr.bf16.mxu1 %v4477_v45  ;;  %v517_v4 = vld [vmem:[%s5745_s14] sm:$0xff]  ;;  %v518_v5 = vld [vmem:[%s5745_s14 + $0x8] sm:$0xff]  ;;  %s5762_s22 = sld [smem:[#allocation20_spill]]  ;;  %s5764_s26 = sld [smem:[#allocation43_spill]] }
  0x7b   :  { %921 = vperm.xlu0 %4752, %v894_v16   ;;  %924 = vperm.xlu1 %4753, %v895_v17   ;;  %v4469_v6 = vpack.c.bf16 %v518_v5, %v517_v4  ;;  %v775_v7 = vld [vmem:[%s5746_s19] sm:$0xff]  ;;  %v519_v17 = vld [vmem:[%s5745_s14 + $0x10] sm:$0xff]  ;;  %s5763_s23 = sld [smem:[#allocation36_spill]]  ;;  %s5765_s0 = sld [smem:[#allocation27_spill]] }
  0x7c   :  { %v1842_v44 = vld [vmem:[%s5747_s24] sm:$0xff]  ;;  %s5766_s9 = sld [smem:[#allocation13_spill]]  ;;  %s5767_s13 = sld [smem:[#allocation44_spill]] }
  0x7d   :  { %v1178_v61 = vld [vmem:[%s5750_s12] sm:$0xff]  ;;  %s5768_s17 = sld [smem:[#allocation39_spill]]  ;;  %s5769_s21 = sld [smem:[#allocation34_spill]] }
  0x7e   :  { %v3802_v4 = vld [vmem:[%s5751_s20] ss:$0 sm:$0xff]  ;;  %s5771_s19 = sld [smem:[#allocation45_spill]]  ;;  %s4954_s20 = smov [#allocation7]  }
  0x7f   :  { %1557 = vperm.xlu0 %4752, %v1550_v18   ;;  %1560 = vperm.xlu1 %4753, %v1551_v19   ;;  %v520_v18 = vld [vmem:[%s5745_s14 + $0x18] sm:$0xff]  ;;  %s5770_s14 = sld [smem:[#allocation40_spill]] }
  0x83   :  { %1569 = vperm.xlu0 %4752, %v1552_v20   ;;  %1572 = vperm.xlu1 %4753, %v1553_v21  }
  0x87   :  { %1581 = vperm.xlu0 %4752, %v1554_v25   ;;  %1584 = vperm.xlu1 %4753, %v1555_v26   ;;  %v4473_v25 = vpack.c.bf16 %v520_v18, %v519_v17  ;;  %v1840_v17 = vld [vmem:[%s5749_s6 + $0x10] sm:$0xff]  ;;  %v1841_v18 = vld [vmem:[%s5749_s6 + $0x18] sm:$0xff] }
  0x8b   :  { %4755 = vperm.xlu0 %4752, %v4754_v27   ;;  %2461 = vperm.xlu1 %4753, %v2459_v32  }
  0x8f   :  { %4760 = vperm.xlu0 %4752, %v4759_v35   ;;  %4765 = vperm.xlu1 %4753, %v4764_v36  }
  0x93   :  { %3003 = vperm.xlu0 %4752, %v3000_v33   ;;  %3006 = vperm.xlu1 %4753, %v3001_v34  }
  0x97   :  { %2628 = vperm.xlu0 %4752, %v3859_v40   ;;  %4770 = vperm.xlu1 %4753, %v4769_v39  }
  0x9b   :  { %3296 = vperm.xlu0 %4752, %v3293_v41   ;;  %3545 = vperm.xlu1 %4753, %v3542_v42  }
  0xe6   :  { %v247_v48 = vpop.permute.xlu0 %246  ;;  %v235_v49 = vpop.permute.xlu1 %234 }
  0xe7   :  { %vm251_vm11 = vcmp.eq.s32.totalorder %v247_v48, %v5300_v47  ;;  %vm239_vm12 = vcmp.eq.s32.totalorder %v235_v49, %v5300_v47  ;;  %v1182_v49 = vld [vmem:[%s5748_s30] sm:$0xff] }
  0xe8   :  { %v3784_v50 = vsel %vm251_vm11, 1.0, %v4950_v22  ;;  %v3782_v51 = vsel %vm239_vm12, 1.0, %v4950_v22 }
  0xe9   :  { %4093 = vmatprep.mubr.msk.f32.mxu1 %vm354_vm9, %v3784_v50  ;;  %4086 = vmatprep.mubr.msk.f32.mxu0 %vm270_vm10, %v3782_v51  ;;  %v1183_v50 = vld [vmem:[%s5748_s30 + $0x8] sm:$0xff] }
  0xea   :  { %v250_v54 = vpop.permute.xlu0 %249  ;;  %v238_v55 = vpop.permute.xlu1 %237  ;;  %v4485_v51 = vpack.c.bf16 %v1183_v50, %v1182_v49  ;;  %v1348_v49 = vld [vmem:[%s5756_s7] sm:$0xff] }
  0xeb   :  { %vm252_vm13 = vcmp.eq.s32.totalorder %v250_v54, %v5300_v47  ;;  %vm240_vm14 = vcmp.eq.s32.totalorder %v238_v55, %v5300_v47  ;;  %v4513_v54 = vpack.c.bf16 %v1845_v53, %v1844_v52  ;;  %v1184_v55 = vld [vmem:[%s5748_s30 + $0x10] sm:$0xff]  ;;  %v1435_v50 = vld [vmem:[%s5757_s10] sm:$0xff]  ;;  %v1349_v52 = vld [vmem:[%s5756_s7 + $0x8] sm:$0xff]  ;;  %v4951_v53 = vmov 0.0|0.0  }
  0xec   :  { %v3785_v57 = vsel %vm252_vm13, 1.0, %v4950_v22  ;;  %v3783_v58 = vsel %vm240_vm14, 1.0, %v4950_v22 }
  0xed   :  { %4094 = vmatmul.mubr.msk.f32.vlgmr.msra.gmra.mrb[0].mxu1 %vm354_vm9, %v3785_v57  ;;  %4087 = vmatmul.mubr.msk.f32.vlgmr.msra.gmra.mrb[0].mxu0 %vm270_vm10, %v3783_v58  ;;  %v1838_v58 = vld [vmem:[%s5749_s6] sm:$0xff] }
  0xee   :  { %v259_v62 = vpop.permute.xlu0 %258  ;;  %v262_v63 = vpop.permute.xlu1 %261  ;;  %4097 = vmatpush3.msra.mxu0 %v5265_v11  ;;  %4480 = vmatpush3.bf16.msra.mxu1 %v4477_v45  ;;  %v1843_v45 = vld [vmem:[%s5747_s24 + $0x8] sm:$0xff]  ;;  %s5772_s24 = sld [smem:[#allocation48_spill]] }
  0xef   :  { %vm263_vm15 = vcmp.eq.s32.totalorder %v259_v62, %v5300_v47  ;;  %vm264_vm0 = vcmp.eq.s32.totalorder %v262_v63, %v5300_v47  ;;  %4462 = vmatprep.subr.bf16.mxu0 %v4461_v56  ;;  %4127 = vmatprep.mubr.msk.f32.mxu1 %vm354_vm9, %v688_v59  ;;  %v4509_v48 = vpack.c.bf16 %v1843_v45, %v1842_v44  ;;  %v1839_v59 = vld [vmem:[%s5749_s6 + $0x8] sm:$0xff]  ;;  %v2008_v45 = vld [vmem:[%s5754_s1] sm:$0xff]  ;;  %s4953_s6 = smov [#allocation4]  }
  0xf0   :  { %v3786_v0 = vsel %vm263_vm15, 1.0, %v4950_v22  ;;  %v3787_v1 = vsel %vm264_vm0, 1.0, %v4950_v22  ;;  %4130 = vmatprep.subr.mxu1 %v775_v7  ;;  %v4517_v60 = vpack.c.bf16 %v1839_v59, %v1838_v58  ;;  %v1179_v62 = vld [vmem:[%s5750_s12 + $0x8] sm:$0xff]  ;;  %v2214_v58 = vld [vmem:[%s5758_s11 + $0x18] sm:$0xff]  ;;  %vm4952_vm0 = vmmov 0  }
  0xf1   :  { %4098 = vmatprep.mubr.msk.f32.mxu0 %vm270_vm10, %v3786_v0  ;;  %4128 = vmatmul.mubr.msk.f32.vlgmr.msra.gmra.mrb[2].mxu1 %vm354_vm9, %v689_v3  ;;  %v4493_v63 = vpack.c.bf16 %v1179_v62, %v1178_v61  ;;  %v2539_v61 = vld [vmem:[%s5759_s15] sm:$0xff] }
  0xf2   :  { %4099 = vmatmul.mubr.msk.f32.vlgmr.msra.gmra.mrb[2].mxu0 %vm270_vm10, %v3787_v1  ;;  %4131 = vmatpush3.msra.mxu1 %v775_v7  ;;  %v898_v8 = vpop.permute.xlu0 %897  ;;  %v901_v12 = vpop.permute.xlu1 %900 }
  0xf3   :  { %4464 = vmatpush3.bf16.msra.mxu0 %v4461_v56  ;;  %4186 = vmatprep.subr.mxu1 %v5259_v9  ;;  %vm902_vm3 = vcmp.eq.s32.totalorder %v898_v8, %v5300_v47  ;;  %vm903_vm6 = vcmp.eq.s32.totalorder %v901_v12, %v5300_v47  ;;  %v1185_v56 = vld [vmem:[%s5748_s30 + $0x18] sm:$0xff]  ;;  %s5774_s30 = sld [smem:[#allocation41_spill]] }
  0xf4   :  { %4466 = vmatprep.subr.bf16.mxu0 %v4465_v2  ;;  %v3805_v32 = vsel %vm902_vm3, 1.0, %v4950_v22  ;;  %v3806_v36 = vsel %vm903_vm6, 1.0, %v4950_v22  ;;  %v4489_v57 = vpack.c.bf16 %v1185_v56, %v1184_v55  ;;  %v2212_v55 = vld [vmem:[%s5758_s11 + $0x8] sm:$0xff] }
  0xf6   :  { %v910_v13 = vpop.permute.xlu0 %909  ;;  %v5333_v14 = vpop.permute.xlu1 %912 }
  0xf7   :  { %4468 = vmatpush3.bf16.msra.mxu0 %v4465_v2  ;;  %vm914_vm7 = vcmp.eq.s32.totalorder %v910_v13, %v5300_v47  ;;  %vm915_vm12 = vcmp.eq.s32.totalorder %v5333_v14, %v5300_v47 }
  0xf8   :  { %4470 = vmatprep.subr.bf16.mxu0 %v4469_v6  ;;  %v3807_v38 = vsel %vm914_vm7, 1.0, %v4950_v22  ;;  %v3808_v40 = vsel %vm915_vm12, 1.0, %v4950_v22 }
  0xfa   :  { %v5335_v15 = vpop.permute.xlu0 %921  ;;  %v5337_v16 = vpop.permute.xlu1 %924 }
  0xfb   :  { %vm926_vm13 = vcmp.eq.s32.totalorder %v5335_v15, %v5300_v47  ;;  %vm927_vm15 = vcmp.eq.s32.totalorder %v5337_v16, %v5300_v47 }
  0xfc   :  { %v3809_v41 = vsel %vm926_vm13, 1.0, %v4950_v22  ;;  %v3810_v43 = vsel %vm927_vm15, 1.0, %v4950_v22 }
  0xfe   :  { %v1558_v19 = vpop.permute.xlu0 %1557  ;;  %v1561_v26 = vpop.permute.xlu1 %1560 }
  0xff   :  { %vm1562_vm2 = vcmp.eq.s32.totalorder %v1558_v19, %v5300_v47  ;;  %vm1563_vm4 = vcmp.eq.s32.totalorder %v1561_v26, %v5300_v47 }
 0x100   :  { %v3828_v30 = vsel %vm1562_vm2, 1.0, %v4950_v22  ;;  %v3829_v34 = vsel %vm1563_vm4, 1.0, %v4950_v22 }
 0x102   :  { %v1570_v27 = vpop.permute.xlu0 %1569  ;;  %v1573_v31 = vpop.permute.xlu1 %1572 }
 0x103   :  { %vm1574_vm5 = vcmp.eq.s32.totalorder %v1570_v27, %v5300_v47  ;;  %vm1575_vm8 = vcmp.eq.s32.totalorder %v1573_v31, %v5300_v47 }
 0x104   :  { %v3830_v35 = vsel %vm1574_vm5, 1.0, %v4950_v22  ;;  %v3831_v39 = vsel %vm1575_vm8, 1.0, %v4950_v22 }
 0x106   :  { %v1582_v33 = vpop.permute.xlu0 %1581  ;;  %v1585_v37 = vpop.permute.xlu1 %1584 }
 0x107   :  { %vm1586_vm11 = vcmp.eq.s32.totalorder %v1582_v33, %v5300_v47  ;;  %vm1587_vm14 = vcmp.eq.s32.totalorder %v1585_v37, %v5300_v47  ;;  %v2010_v33 = vld [vmem:[%s5752_s4] sm:$0xff] }
 0x108   :  { %v3833_v42 = vsel %vm1587_vm14, 1.0, %v4950_v22 }
 0x10a   :  { %v5409_v0 = vpop.permute.xlu1 %2461  ;;  %v4756_v62 = vpop.permute.xlu0 %4755 }
 0x10b   :  { %vm2463_vm2 = vcmp.eq.s32.totalorder %v5409_v0, %v5300_v47 }
 0x10e   :  { %v4766_v7 = vpop.permute.xlu1 %4765  ;;  %v4761_v0 = vpop.permute.xlu0 %4760 }
 0x10f   :  { %v4768_v19 = vunpack.i.h.bf16 %v4766_v7 }
 0x1c0   :  { %v4095_v20 = vpop.f32.mrb[0].mxu1  ;;  %v4088_v21 = vpop.f32.mrb[0].mxu0 }
 0x1c1   :  { %v427_v23 = vpop.f32.mrb[1].mxu1  ;;  %v343_v24 = vpop.f32.mrb[1].mxu0 }
 0x1c2   :  { %4109 = vmatprep.mubr.msk.f32.mxu0 %vm525_vm1, %v427_v23  ;;  %v4767_v23 = vunpack.i.l.bf16 %v4766_v7 }
 0x1c3   :  { %4110 = vmatmul.mubr.msk.f32.vlgmr.msra.gmra.mrb[4].mxu0 %vm525_vm1, %v4095_v20 }
 0x1c4   :  { %4472 = vmatpush3.bf16.msra.mxu0 %v4469_v6  ;;  %4120 = vmatprep.mubr.msk.f32.mxu0 %vm525_vm1, %v343_v24 }
 0x1c5   :  { %v4100_v28 = vpop.f32.mrb[2].mxu0  ;;  %4474 = vmatprep.subr.bf16.mxu0 %v4473_v25 }
 0x1c6   :  { %v508_v29 = vpop.f32.mrb[3].mxu0 }
 0x1c7   :  { %4132 = vmatprep.mubr.msk.f32.mxu1 %vm270_vm10, %v508_v29  ;;  %v1180_v29 = vld [vmem:[%s5750_s12 + $0x10] sm:$0xff] }
 0x1c8   :  { %4476 = vmatpush3.bf16.msra.mxu0 %v4473_v25  ;;  %4133 = vmatmul.mubr.msk.f32.vlgmr.msra.gmra.mrb[2].mxu1 %vm270_vm10, %v4100_v28  ;;  %v4521_v28 = vpack.c.bf16 %v1841_v18, %v1840_v17  ;;  %v4758_v17 = vunpack.i.h.bf16 %v4756_v62 }
 0x1c9   :  { %4188 = vmatprep.mubr.msk.f32.mxu1 %vm270_vm10, %v3828_v30  ;;  %4482 = vmatprep.subr.bf16.mxu0 %v5261_v10  ;;  %v1181_v30 = vld [vmem:[%s5750_s12 + $0x18] sm:$0xff]  ;;  %s3663_s12 = sshll.u32 %s4953_s6, 4  ;;  %s3664_s12 = int_to_ptr.vmem [resolvable:$true] %s3663_s12 }
 0x1ca   :  { %4187 = vmatpush3.msra.mxu1 %v5259_v9  ;;  %v4497_v37 = vpack.c.bf16 %v1181_v30, %v1180_v29  ;;  %v2300_v30 = vld [vmem:[%s5763_s23] sm:$0xff]  ;;  %p4782_p1 = scmp.lt.s32.totalorder %s3664_s12, %s3664_s12 }
 0x1cb   :  { %4121 = vmatmul.mubr.msk.f32.vlgmr.msra.gmra.mrb[4].mxu0 %vm525_vm1, %v4088_v21  ;;  %4506 = vmatprep.subr.bf16.mxu1 %v5261_v10 }
 0x1cc   :  { %4484 = vmatpush3.bf16.msra.mxu0 %v5261_v10  ;;  %4139 = vmatprep.mubr.msk.f32.mxu0 %vm354_vm9, %v3805_v32 }
 0x1cd   :  { %4189 = vmatmul.mubr.msk.f32.vlgmr.msra.gmra.mrb[4].mxu1 %vm270_vm10, %v3829_v34  ;;  %4142 = vmatprep.subr.mxu0 %v5259_v9  ;;  %v2011_v34 = vld [vmem:[%s5752_s4 + $0x8] sm:$0xff]  ;;  %s3688_s4 = sshll.u32 %s4954_s20, 4  ;;  %s3689_s4 = int_to_ptr.vmem [resolvable:$true] %s3688_s4 }
 0x1ce   :  { %4508 = vmatpush3.bf16.msra.mxu1 %v5261_v10  ;;  %4195 = vmatprep.mubr.msk.f32.mxu1 %vm354_vm9, %v3830_v35  ;;  %v3832_v10 = vsel %vm1586_vm11, 1.0, %v4950_v22 }
 0x1cf   :  { %4140 = vmatmul.mubr.msk.f32.vlgmr.msra.gmra.mrb[6].mxu0 %vm354_vm9, %v3806_v36  ;;  %4198 = vmatprep.subr.mxu1 %v5265_v11 }
 0x1d0   :  { %4143 = vmatpush3.msra.mxu0 %v5259_v9  ;;  %4144 = vmatprep.mubr.msk.f32.mxu0 %vm270_vm10, %v3807_v38 }
 0x1d1   :  { %4196 = vmatmul.mubr.msk.f32.vlgmr.msra.gmra.mrb[6].mxu1 %vm354_vm9, %v3831_v39  ;;  %4147 = vmatprep.subr.mxu0 %v5265_v11 }
 0x1d2   :  { %4200 = vmatprep.mubr.msk.f32.mxu1 %vm270_vm10, %v3832_v10  ;;  %4199 = vmatpush3.msra.mxu1 %v5265_v11  ;;  %v1350_v10 = vld [vmem:[%s5753_s28] sm:$0xff] }
 0x1d3   :  { %4145 = vmatmul.mubr.msk.f32.vlgmr.msra.gmra.mrb[8].mxu0 %vm270_vm10, %v3808_v40  ;;  %4510 = vmatprep.subr.bf16.mxu1 %v4509_v48  ;;  %v1351_v40 = vld [vmem:[%s5753_s28 + $0x8] sm:$0xff]  ;;  %s4777_s28 = scalar_lea.vmem %s3664_s12, 256 }
 0x1d4   :  { %4149 = vmatprep.mubr.msk.f32.mxu0 %vm270_vm10, %v3809_v41  ;;  %4148 = vmatpush3.msra.mxu0 %v5265_v11  ;;  %v4525_v41 = vpack.c.bf16 %v2011_v34, %v2010_v33  ;;  %v4501_v44 = vpack.c.bf16 %v1351_v40, %v1350_v10  ;;  %v2304_v10 = vld [vmem:[%s5763_s23 + $0x20] sm:$0xff]  ;;  %v2305_v40 = vld [vmem:[%s5763_s23 + $0x28] sm:$0xff]  ;;  %p4778_p0 = scmp.ne.s32.totalorder %s3664_s12, %s4777_s28  ;;  %p4783_p2 = scmp.lt.s32.totalorder %s4777_s28, %s4777_s28 }
 0x1d5   :  { %4201 = vmatmul.mubr.msk.f32.vlgmr.msra.gmra.mrb[8].mxu1 %vm270_vm10, %v3833_v42  ;;  %4486 = vmatprep.subr.bf16.mxu0 %v4485_v51 }
 0x1d6   :  { %4512 = vmatpush3.bf16.msra.mxu1 %v4509_v48  ;;  %v2095_v48 = vld [vmem:[%s5755_s2] sm:$0xff]  ;;  %p4784_p3 = por %p4783_p2, %p4782_p1 }
 0x1d7   :  { %4150 = vmatmul.mubr.msk.f32.vlgmr.msra.gmra.mrb[10].mxu0 %vm270_vm10, %v3810_v43  ;;  %4514 = vmatprep.subr.bf16.mxu1 %v4513_v54 }
 0x1d8   :  { %4488 = vmatpush3.bf16.msra.mxu0 %v4485_v51  ;;  %v2009_v51 = vld [vmem:[%s5754_s1 + $0x8] sm:$0xff]  ;;  %p4785_p4 = pnand %p4784_p3, %p4778_p0 }
 0x1d9   :  { %4490 = vmatprep.subr.bf16.mxu0 %v4489_v57 }
 0x1da   :  { %4516 = vmatpush3.bf16.msra.mxu1 %v4513_v54  ;;  %v2211_v54 = vld [vmem:[%s5758_s11] sm:$0xff] }
 0x1db   :  { %4518 = vmatprep.subr.bf16.mxu1 %v4517_v60  ;;  %v4557_v56 = vpack.c.bf16 %v2212_v55, %v2211_v54  ;;  %v2312_v54 = vld [vmem:[%s5763_s23 + $0x60] sm:$0xff]  ;;  %v2313_v55 = vld [vmem:[%s5763_s23 + $0x68] sm:$0xff] }
 0x1dc   :  { %4492 = vmatpush3.bf16.msra.mxu0 %v4489_v57  ;;  %v2213_v57 = vld [vmem:[%s5758_s11 + $0x10] sm:$0xff] }
 0x1dd   :  { %4494 = vmatprep.subr.bf16.mxu0 %v4493_v63  ;;  %v4560_v59 = vpack.c.bf16 %v2214_v58, %v2213_v57  ;;  %v2314_v57 = vld [vmem:[%s5763_s23 + $0x70] sm:$0xff]  ;;  %v2315_v58 = vld [vmem:[%s5763_s23 + $0x78] sm:$0xff] }
 0x29b   :  { %v4134_v1 = vpop.f32.mrb[2].mxu1 }
 0x29c   :  { %v848_v2 = vpop.f32.mrb[3].mxu1 }
 0x29e   :  { %v4122_v3 = vpop.f32.mrb[4].mxu0 }
 0x29f   :  { %v4661_v5 = vadd.f32 %v4134_v1, %v4122_v3  ;;  %v679_v6 = vpop.f32.mrb[5].mxu0  ;;  %v3825_v3 = vld [vmem:[%s5761_s18] ss:$0 sm:$0xff] }
 0x2a0   :  { %v4662_v8 = vadd.f32 %v848_v2, %v679_v6  ;;  %v4190_v12 = vpop.f32.mrb[4].mxu1 }
 0x2a1   :  { %v867_v13 = vadd.f32 %v4661_v5, %v3802_v4  ;;  %v1665_v14 = vpop.f32.mrb[5].mxu1  ;;  %v4763_v5 = vunpack.i.h.bf16 %v4761_v0 }
 0x2a2   :  { %v866_v15 = vadd.f32 %v4662_v8, %v3802_v4  ;;  %v4141_v16 = vpop.f32.mrb[6].mxu0  ;;  %v4762_v8 = vunpack.i.l.bf16 %v4761_v0  ;;  %v2831_v0 = vld [vmem:[%s5764_s26 + $0x18] sm:$0xff] }
 0x2a3   :  { %v875_v20 = vmax.f32 %v867_v13, 0.0  ;;  %v1006_v21 = vpop.f32.mrb[7].mxu0 }
 0x2a4   :  { %v874_v24 = vmax.f32 %v866_v15, 0.0  ;;  %v4197_v25 = vpop.f32.mrb[6].mxu1 }
 0x2a5   :  { %v887_v26 = vmul.f32 %v4768_v19, %v875_v20  ;;  %v1748_v27 = vpop.f32.mrb[7].mxu1  ;;  %v5472_v20 = vshrl.u32 %v231_v46, 7  ;;  %v2301_v46 = vld [vmem:[%s5763_s23 + $0x8] sm:$0xff] }
 0x2a6   :  { %v886_v31 = vmul.f32 %v4767_v23, %v874_v24  ;;  %4211 = vmatprep.mubr.msk.f32.mxu1 %vm525_vm1, %v1748_v27  ;;  %v4146_v32 = vpop.f32.mrb[8].mxu0  ;;  %v3851_v24 = vld [vmem:[%s5762_s22] ss:$0 sm:$0xff] }
 0x2a7   :  { %889 = vst [vmem:[#allocation2 + $0x8] sm:$0xff] %v887_v26  ;;  %4212 = vmatmul.mubr.msk.f32.vlgmr.msra.gmra.mrb[10].mxu1 %vm525_vm1, %v4197_v25  ;;  %v1088_v35 = vpop.f32.mrb[9].mxu0  ;;  %vm2224_vm3 = vcmp.eq.s32.totalorder %v3851_v24, %v5472_v20 }
 0x2a8   :  { %888 = vst [vmem:[#allocation2] sm:$0xff] %v886_v31  ;;  %v4202_v36 = vpop.f32.mrb[8].mxu1  ;;  %4520 = vmatpush3.bf16.msra.mxu1 %v4517_v60  ;;  %4222 = vmatprep.mubr.msk.f32.mxu1 %vm525_vm1, %v1665_v14  ;;  %v5421_v38 = vpack.c.bf16 %v887_v26, %v886_v31  ;;  %v3855_v60 = vsel %vm2463_vm2, 1.0, %v4950_v22  ;;  %v3852_v34 = vsel %vm2224_vm3, 1.0, %v4950_v22 }
 0x2a9   :  { %4160 = vmatprep.mubr.msk.f32.mxu0 %vm525_vm1, %v1088_v35  ;;  %v1829_v39 = vpop.f32.mrb[9].mxu1  ;;  %4522 = vmatprep.subr.bf16.mxu1 %v4521_v28  ;;  %v4533_v35 = vpack.c.bf16 %v2301_v46, %v2300_v30  ;;  %v2838_v30 = vld [vmem:[%s5764_s26 + $0x50] sm:$0xff] }
 0x2aa   :  { %4161 = vmatmul.mubr.msk.f32.vlgmr.msra.gmra.mrb[12].mxu0 %vm525_vm1, %v4146_v32  ;;  %v4151_v42 = vpop.f32.mrb[10].mxu0 }
 0x2ab   :  { %4496 = vmatpush3.bf16.msra.mxu0 %v4493_v63  ;;  %4171 = vmatprep.mubr.msk.f32.mxu0 %vm525_vm1, %v1006_v21  ;;  %v1169_v43 = vpop.f32.mrb[11].mxu0  ;;  %v3848_v63 = vld [vmem:[%s5760_s16] ss:$0 sm:$0xff]  ;;  %v4757_v21 = vunpack.i.l.bf16 %v4756_v62  ;;  %v2830_v62 = vld [vmem:[%s5764_s26 + $0x10] sm:$0xff] }
 0x2ac   :  { %4524 = vmatpush3.bf16.msra.mxu1 %v4521_v28  ;;  %4498 = vmatprep.subr.bf16.mxu0 %v4497_v37 }
 0x2ad   :  { %4526 = vmatprep.subr.bf16.mxu1 %v4525_v41 }
 0x2af   :  { %4500 = vmatpush3.bf16.msra.mxu0 %v4497_v37  ;;  %4223 = vmatmul.mubr.msk.f32.vlgmr.msra.gmra.mrb[10].mxu1 %vm525_vm1, %v4190_v12  ;;  %v2303_v37 = vld [vmem:[%s5763_s23 + $0x18] sm:$0xff] }
 0x2b0   :  { %4502 = vmatprep.subr.bf16.mxu0 %v4501_v44  ;;  %4528 = vmatpush3.bf16.msra.mxu1 %v4525_v41  ;;  %v4539_v41 = vpack.c.bf16 %v2305_v40, %v2304_v10 }
 0x2b1   :  { %4229 = vmatprep.mubr.msk.f32.mxu1 %vm354_vm9, %v2008_v45  ;;  %4232 = vmatprep.subr.mxu1 %v2095_v48  ;;  %v2308_v45 = vld [vmem:[%s5763_s23 + $0x40] sm:$0xff] }
 0x2b2   :  { %4172 = vmatmul.mubr.msk.f32.vlgmr.msra.gmra.mrb[12].mxu0 %vm525_vm1, %v4141_v16 }
 0x2b3   :  { %4504 = vmatpush3.bf16.msra.mxu0 %v4501_v44  ;;  %4178 = vmatprep.mubr.msk.f32.mxu0 %vm354_vm9, %v1348_v49 }
 0x2b4   :  { %4181 = vmatprep.subr.mxu0 %v1435_v50 }
 0x2b7   :  { %4230 = vmatmul.mubr.msk.f32.vlgmr.msra.gmra.mrb[10].mxu1 %vm354_vm9, %v2009_v51  ;;  %v2311_v51 = vld [vmem:[%s5763_s23 + $0x58] sm:$0xff] }
 0x2b8   :  { %4234 = vmatprep.mubr.msk.f32.mxu1 %vm270_vm10, %v1829_v39  ;;  %4233 = vmatpush3.msra.mxu1 %v2095_v48  ;;  %v2309_v48 = vld [vmem:[%s5763_s23 + $0x48] sm:$0xff] }
 0x2b9   :  { %4556 = vmatprep.subr.bf16.mxu1 %v4951_v53  ;;  %v4545_v49 = vpack.c.bf16 %v2309_v48, %v2308_v45  ;;  %v3300_v48 = vld [vmem:[%s5770_s14] sm:$0xff] }
 0x2ba   :  { %4179 = vmatmul.mubr.msk.f32.vlgmr.msra.gmra.mrb[12].mxu0 %vm354_vm9, %v1349_v52 }
 0x2bb   :  { %4182 = vmatpush3.msra.mxu0 %v1435_v50  ;;  %4183 = vmatprep.mubr.msk.f32.mxu0 %vm270_vm10, %v1169_v43  ;;  %v2307_v43 = vld [vmem:[%s5763_s23 + $0x38] sm:$0xff]  ;;  %v2310_v50 = vld [vmem:[%s5763_s23 + $0x50] sm:$0xff] }
 0x2bc   :  { %4529 = vmatprep.subr.bf16.mxu0 %v4951_v53  ;;  %v4548_v52 = vpack.c.bf16 %v2311_v51, %v2310_v50 }
 0x2bf   :  { %4235 = vmatmul.mubr.msk.f32.vlgmr.msra.gmra.mrb[10].mxu1 %vm270_vm10, %v4202_v36  ;;  %v2302_v36 = vld [vmem:[%s5763_s23 + $0x10] sm:$0xff] }
 0x2c0   :  { %4558 = vmatpush3.bf16.msra.mxu1 %v4557_v56  ;;  %4287 = vmatprep.mubr.msk.f32.mxu1 %vm4952_vm0, %v4950_v22  ;;  %v4536_v39 = vpack.c.bf16 %v2303_v37, %v2302_v36  ;;  %v4551_v56 = vpack.c.bf16 %v2313_v55, %v2312_v54  ;;  %v2635_v36 = vld [vmem:[%s5767_s13] sm:$0xff]  ;;  %v2636_v37 = vld [vmem:[%s5767_s13 + $0x8] sm:$0xff]  ;;  %v2637_v54 = vld [vmem:[%s5767_s13 + $0x10] sm:$0xff] }
 0x2c1   :  { %4559 = vmatprep.subr.bf16.mxu1 %v4951_v53 }
 0x2c2   :  { %4184 = vmatmul.mubr.msk.f32.vlgmr.msra.gmra.mrb[12].mxu0 %vm270_vm10, %v4151_v42  ;;  %v2306_v42 = vld [vmem:[%s5763_s23 + $0x30] sm:$0xff] }
 0x2c3   :  { %4241 = vmatprep.mubr.msk.f32.mxu0 %vm4952_vm0, %v4950_v22  ;;  %v4542_v44 = vpack.c.bf16 %v2307_v43, %v2306_v42  ;;  %v3858_v42 = vld [vmem:[%s5768_s17] ss:$0 sm:$0xff] }
 0x2c4   :  { %4561 = vmatpush3.bf16.msra.mxu1 %v4560_v59  ;;  %v4554_v59 = vpack.c.bf16 %v2315_v58, %v2314_v57  ;;  %v3302_v57 = vld [vmem:[%s5770_s14 + $0x10] sm:$0xff]  ;;  %v3303_v58 = vld [vmem:[%s5770_s14 + $0x18] sm:$0xff] }
 0x2c5   :  { %4290 = vmatprep.subr.mxu1 %v4950_v22 }
 0x2c7   :  { %4288 = vmatmul.mubr.msk.f32.vlgmr.msra.gmra.mrb[12].mxu1 %vm525_vm1, %v5259_v9 }
 0x2c8   :  { %4291 = vmatpush3.msra.mxu1 %v5265_v11  ;;  %4292 = vmatprep.mubr.msk.f32.mxu1 %vm4952_vm0, %v4950_v22 }
 0x2c9   :  { %4295 = vmatprep.subr.mxu1 %v4950_v22 }
 0x2cb   :  { %4293 = vmatmul.mubr.msk.f32.vlgmr.msra.gmra.mrb[14].mxu1 %vm270_vm10, %v3855_v60  ;;  %v2828_v60 = vld [vmem:[%s5764_s26] sm:$0xff] }
 0x2cc   :  { %4297 = vmatprep.mubr.msk.f32.mxu1 %vm4952_vm0, %v4950_v22  ;;  %4296 = vmatpush3.msra.mxu1 %v2539_v61  ;;  %v2829_v61 = vld [vmem:[%s5764_s26 + $0x8] sm:$0xff] }
 0x392   :  { %v4236_v9 = vpop.f32.mrb[10].mxu1 }
 0x393   :  { %v2187_v1 = vadd.f32 %v4236_v9, %v3848_v63  ;;  %v2168_v2 = vpop.f32.mrb[11].mxu1  ;;  %v4574_v9 = vpack.c.bf16 %v2831_v0, %v2830_v62  ;;  %v4614_v62 = vpack.c.bf16 %v3303_v58, %v3302_v57  ;;  %v3305_v0 = vld [vmem:[%s5770_s14 + $0x28] sm:$0xff] }
 0x394   :  { %v2186_v4 = vadd.f32 %v3848_v63, %v2168_v2  ;;  %v4570_v63 = vpack.c.bf16 %v2829_v61, %v2828_v60  ;;  %v2833_v2 = vld [vmem:[%s5764_s26 + $0x28] sm:$0xff] }
 0x395   :  { %v2195_v6 = vmax.f32 %v2187_v1, 0.0  ;;  %v4185_v7 = vpop.f32.mrb[12].mxu0  ;;  %v2832_v1 = vld [vmem:[%s5764_s26 + $0x20] sm:$0xff] }
 0x396   :  { %v2194_v12 = vmax.f32 %v2186_v4, 0.0  ;;  %v1527_v13 = vadd.f32 %v4185_v7, %v3825_v3  ;;  %v1508_v14 = vpop.f32.mrb[13].mxu0  ;;  %4571 = vmatprep.subr.bf16.mxu1 %v4570_v63  ;;  %v2834_v4 = vld [vmem:[%s5764_s26 + $0x30] sm:$0xff]  ;;  %v2836_v7 = vld [vmem:[%s5764_s26 + $0x40] sm:$0xff] }
 0x397   :  { %v2207_v15 = vmul.f32 %v4763_v5, %v2195_v6  ;;  %v1526_v16 = vadd.f32 %v3825_v3, %v1508_v14  ;;  %v4578_v3 = vpack.c.bf16 %v2833_v2, %v2832_v1  ;;  %v2835_v5 = vld [vmem:[%s5764_s26 + $0x38] sm:$0xff]  ;;  %v2642_v14 = vadd.s32 8, %v5472_v20  ;;  %v4774_v1 = vld [vmem:[%s5183_s29] sm:$0xff] }
 0x398   :  { %v2206_v18 = vmul.f32 %v4762_v8, %v2194_v12  ;;  %v1535_v19 = vmax.f32 %v1527_v13, 0.0  ;;  %v4582_v6 = vpack.c.bf16 %v2835_v5, %v2834_v4  ;;  %v2837_v8 = vld [vmem:[%s5764_s26 + $0x48] sm:$0xff]  ;;  %v3863_v13 = vld [vmem:[%s5765_s0] ss:$0 sm:$0xff]  ;;  %v3306_v5 = vld [vmem:[%s5770_s14 + $0x30] sm:$0xff] }
 0x399   :  { %2209 = vst [vmem:[#allocation6 + $0x8] sm:$0xff] %v2207_v15  ;;  %v1534_v23 = vmax.f32 %v1526_v16, 0.0  ;;  %v4586_v12 = vpack.c.bf16 %v2837_v8, %v2836_v7  ;;  %vm2660_vm4 = vcmp.eq.s32.totalorder %v3863_v13, %v5472_v20  ;;  %v3860_v16 = vld [vmem:[%s5766_s9] ss:$0 sm:$0xff]  ;;  %vm2661_vm5 = vcmp.eq.s32.totalorder %v3863_v13, %v2642_v14  ;;  %v4775_v13 = vld [vmem:[%s5183_s29 + $0x8] sm:$0xff]  ;;  %s5773_s29 = sld [smem:[#allocation46_spill]] }
 0x39a   :  { %2208 = vst [vmem:[#allocation6] sm:$0xff] %v2206_v18  ;;  %v1547_v25 = vmul.f32 %v4758_v17, %v1535_v19  ;;  %v5475_v26 = vpop.f32.mrb[12].mxu1  ;;  %v5477_v27 = vpack.c.bf16 %v2207_v15, %v2206_v18  ;;  %v3864_v18 = vsel %vm2660_vm4, 1.0, %v4950_v22  ;;  %vm2647_vm6 = vcmp.eq.s32.totalorder %v3860_v16, %v5472_v20  ;;  %v3095_v4 = vld [vmem:[%s5771_s19] sm:$0xff] }
 0x39b   :  { %v1546_v28 = vmul.f32 %v4757_v21, %v1534_v23  ;;  %v4289_v29 = vpop.f32.mrb[13].mxu1  ;;  %v3865_v23 = vsel %vm2661_vm5, 1.0, %v4950_v22  ;;  %v3861_v24 = vsel %vm2647_vm6, 1.0, %v4950_v22  ;;  %vm2648_vm7 = vcmp.eq.s32.totalorder %v3860_v16, %v2642_v14  ;;  %v3308_v8 = vld [vmem:[%s5770_s14 + $0x40] sm:$0xff]  ;;  %v3311_v16 = vld [vmem:[%s5770_s14 + $0x58] sm:$0xff] }
 0x39c   :  { %1549 = vst [vmem:[#allocation4 + $0x8] sm:$0xff] %v1547_v25 }
 0x39d   :  { %1548 = vst [vmem:[#allocation4] sm:$0xff] %v1546_v28  ;;  %v4530_v31 = vpack.c.bf16 %v1547_v25, %v1546_v28  ;;  %v3004_v25 = vpop.permute.xlu0 %3003  ;;  %v3862_v28 = vsel %vm2648_vm7, 1.0, %v4950_v22 }
 0x39e   :  { %v2535_v32 = vpop.f32.mrb[14].mxu1  ;;  %vm3008_vm8 = vcmp.eq.s32.totalorder %v3004_v25, %v5300_v47 }
 0x39f   :  { %v4294_v33 = vpop.f32.mrb[15].mxu1  ;;  %4298 = vmatmul.mubr.msk.f32.vlgmr.msra.gmra.mrb[16].mxu1 %vm270_vm10, %v2535_v32  ;;  %4531 = vmatpush3.bf16.msra.mxu0 %v4530_v31  ;;  %v3872_v29 = vsel %vm3008_vm8, 1.0, %v4950_v22  ;;  %v2840_v31 = vld [vmem:[%s5764_s26 + $0x60] sm:$0xff]  ;;  %v2841_v32 = vld [vmem:[%s5764_s26 + $0x68] sm:$0xff] }
 0x3a0   :  { %4532 = vmatprep.subr.bf16.mxu0 %v4951_v53  ;;  %4573 = vmatpush3.bf16.msra.mxu1 %v4570_v63  ;;  %v2842_v33 = vld [vmem:[%s5764_s26 + $0x70] sm:$0xff]  ;;  %v3304_v63 = vld [vmem:[%s5770_s14 + $0x20] sm:$0xff] }
 0x3a1   :  { %4575 = vmatprep.subr.bf16.mxu1 %v4574_v9  ;;  %v2629_v51 = vpop.permute.xlu0 %2628 }
 0x3a2   :  { %4242 = vmatmul.mubr.msk.f32.vlgmr.msra.gmra.mrb[14].mxu0 %vm354_vm9, %v3852_v34  ;;  %v2843_v34 = vld [vmem:[%s5764_s26 + $0x78] sm:$0xff] }
 0x3a3   :  { %4534 = vmatpush3.bf16.msra.mxu0 %v4533_v35  ;;  %4276 = vmatprep.mubr.msk.f32.mxu0 %vm4952_vm0, %v4950_v22  ;;  %v4598_v35 = vpack.c.bf16 %v2843_v34, %v2842_v33 }
 0x3a4   :  { %4535 = vmatprep.subr.bf16.mxu0 %v4951_v53  ;;  %4577 = vmatpush3.bf16.msra.mxu1 %v4574_v9 }
 0x3a5   :  { %4579 = vmatprep.subr.bf16.mxu1 %v4578_v3 }
 0x3a7   :  { %4537 = vmatpush3.bf16.msra.mxu0 %v4536_v39  ;;  %v4602_v39 = vpack.c.bf16 %v2636_v37, %v2635_v36 }
 0x3a8   :  { %4538 = vmatprep.subr.bf16.mxu0 %v4951_v53  ;;  %4581 = vmatpush3.bf16.msra.mxu1 %v4578_v3  ;;  %v4617_v3 = vpack.c.bf16 %v3305_v0, %v3304_v63 }
 0x3a9   :  { %4583 = vmatprep.subr.bf16.mxu1 %v4582_v6 }
 0x3ab   :  { %4540 = vmatpush3.bf16.msra.mxu0 %v4539_v41 }
 0x3ac   :  { %4541 = vmatprep.subr.bf16.mxu0 %v4951_v53  ;;  %4585 = vmatpush3.bf16.msra.mxu1 %v4582_v6  ;;  %v3307_v6 = vld [vmem:[%s5770_s14 + $0x38] sm:$0xff] }
 0x3ad   :  { %4587 = vmatprep.subr.bf16.mxu1 %v4586_v12  ;;  %v4620_v7 = vpack.c.bf16 %v3307_v6, %v3306_v5 }
 0x3af   :  { %4543 = vmatpush3.bf16.msra.mxu0 %v4542_v44  ;;  %v3881_v44 = vld [vmem:[%s5769_s21] ss:$0 sm:$0xff] }
 0x3b0   :  { %4544 = vmatprep.subr.bf16.mxu0 %v4951_v53  ;;  %4589 = vmatpush3.bf16.msra.mxu1 %v4586_v12  ;;  %vm3217_vm12 = vcmp.eq.s32.totalorder %v3881_v44, %v5472_v20  ;;  %v3309_v12 = vld [vmem:[%s5770_s14 + $0x48] sm:$0xff] }
 0x3b1   :  { %v3882_v55 = vsel %vm3217_vm12, 1.0, %v4950_v22  ;;  %v4623_v14 = vpack.c.bf16 %v3309_v12, %v3308_v8 }
 0x3b3   :  { %4546 = vmatpush3.bf16.msra.mxu0 %v4545_v49  ;;  %v3301_v49 = vld [vmem:[%s5770_s14 + $0x8] sm:$0xff] }
 0x3b4   :  { %4547 = vmatprep.subr.bf16.mxu0 %v4951_v53 }
 0x3b7   :  { %4549 = vmatpush3.bf16.msra.mxu0 %v4548_v52 }
 0x3b8   :  { %4550 = vmatprep.subr.bf16.mxu0 %v4951_v53 }
 0x3bb   :  { %4552 = vmatpush3.bf16.msra.mxu0 %v4551_v56  ;;  %v4611_v56 = vpack.c.bf16 %v3301_v49, %v3300_v48 }
 0x3bc   :  { %4553 = vmatprep.subr.bf16.mxu0 %v4951_v53 }
 0x3bf   :  { %4555 = vmatpush3.bf16.msra.mxu0 %v4554_v59 }
 0x3c0   :  { %4563 = vmatprep.subr.bf16.mxu0 %v5477_v27 }
 0x472   :  { %v2609_v15 = vpop.f32.mrb[16].mxu1 }
 0x473   :  { %v4299_v17 = vpop.f32.mrb[17].mxu1 }
 0x475   :  { %v2296_v19 = vpop.f32.mrb[14].mxu0 }
 0x476   :  { %v4243_v21 = vpop.f32.mrb[15].mxu0  ;;  %4277 = vmatmul.mubr.f32.vlgmr.msra.gmra.mrb[16].mxu0 %v2296_v19  ;;  %v3313_v19 = vld [vmem:[%s5770_s14 + $0x68] sm:$0xff] }
 0x477   :  { %4565 = vmatpush3.bf16.msra.mxu0 %v5477_v27  ;;  %4304 = vmatprep.mubr.msk.f32.mxu0 %vm354_vm9, %v3864_v18  ;;  %v3007_v27 = vpop.permute.xlu1 %3006  ;;  %v3312_v18 = vld [vmem:[%s5770_s14 + $0x60] sm:$0xff] }
 0x478   :  { %4567 = vmatprep.subr.bf16.mxu0 %v5421_v38  ;;  %vm3009_vm11 = vcmp.eq.s32.totalorder %v3007_v27, %v5300_v47  ;;  %v2839_v47 = vld [vmem:[%s5764_s26 + $0x58] sm:$0xff]  ;;  %v4629_v21 = vpack.c.bf16 %v3313_v19, %v3312_v18  ;;  %v3210_v27 = vld [vmem:[%s5772_s24] sm:$0xff] }
 0x479   :  { %v4590_v46 = vpack.c.bf16 %v2839_v47, %v2838_v30 }
 0x47a   :  { %4305 = vmatmul.mubr.msk.f32.vlgmr.msra.gmra.mrb[18].mxu0 %vm354_vm9, %v3865_v23  ;;  %v3314_v23 = vld [vmem:[%s5770_s14 + $0x70] sm:$0xff] }
 0x47b   :  { %4569 = vmatpush3.bf16.msra.mxu0 %v5421_v38  ;;  %4311 = vmatprep.mubr.msk.f32.mxu0 %vm354_vm9, %v3861_v24  ;;  %v3873_v38 = vsel %vm3009_vm11, 1.0, %v4950_v22  ;;  %v3315_v24 = vld [vmem:[%s5770_s14 + $0x78] sm:$0xff] }
 0x47c   :  { %4360 = vmatprep.subr.mxu0 %v5265_v11  ;;  %4591 = vmatprep.subr.bf16.mxu1 %v4590_v46  ;;  %v4632_v25 = vpack.c.bf16 %v3315_v24, %v3314_v23 }
 0x47d   :  { %4593 = vmatpush3.bf16.msra.mxu1 %v4590_v46  ;;  %v3878_v46 = vld [vmem:[%s5773_s29] ss:$0 sm:$0xff] }
 0x482   :  { %4312 = vmatmul.mubr.msk.f32.vlgmr.msra.gmra.mrb[18].mxu0 %vm354_vm9, %v3862_v28  ;;  %v4776_v28 = vld [vmem:[%s4968_s5] sm:$0xff]  ;;  %s5775_s5 = sld [smem:[#allocation47_spill]] }
 0x483   :  { %4362 = vmatprep.mubr.msk.f32.mxu0 %vm270_vm10, %v3872_v29  ;;  %4361 = vmatpush3.msra.mxu0 %v5265_v11  ;;  %v4594_v11 = vpack.c.bf16 %v2841_v32, %v2840_v31  ;;  %v3297_v29 = vpop.permute.xlu0 %3296  ;;  %v4771_v31 = vpop.permute.xlu1 %4770 }
 0x484   :  { %4370 = vmatprep.subr.mxu0 %v4950_v22  ;;  %v4772_v37 = vunpack.i.l.bf16 %v4771_v31 }
 0x485   :  { %4595 = vmatprep.subr.bf16.mxu1 %v4594_v11 }
 0x486   :  { %4363 = vmatmul.mubr.msk.f32.vlgmr.msra.gmra.mrb[20].mxu0 %vm270_vm10, %v3873_v38  ;;  %4597 = vmatpush3.bf16.msra.mxu1 %v4594_v11 }
 0x487   :  { %4372 = vmatprep.mubr.msk.f32.mxu0 %vm4952_vm0, %v4950_v22  ;;  %4599 = vmatprep.subr.bf16.mxu1 %v4598_v35  ;;  %v3546_v8 = vpop.permute.xlu1 %3545 }
 0x488   :  { %v3549_v44 = vld [vmem:[%s5775_s5] sm:$0xff] }
 0x489   :  { %v3557_v58 = vld [vmem:[%s5775_s5 + $0x40] sm:$0xff] }
 0x48a   :  { %4601 = vmatpush3.bf16.msra.mxu1 %v4598_v35  ;;  %v4773_v35 = vunpack.i.h.bf16 %v4771_v31  ;;  %v3561_v0 = vld [vmem:[%s5775_s5 + $0x60] sm:$0xff] }
 0x48b   :  { %4603 = vmatprep.subr.bf16.mxu1 %v4602_v39 }
 0x549   :  { %v2382_v10 = vpop.f32.mrb[16].mxu0 }
 0x54a   :  { %v2456_v40 = vadd.f32 %v5475_v26, %v2382_v10  ;;  %v4278_v41 = vpop.f32.mrb[17].mxu0  ;;  %v2638_v26 = vld [vmem:[%s5767_s13 + $0x18] sm:$0xff]  ;;  %v3885_v10 = vld [vmem:[%s5774_s30] ss:$0 sm:$0xff] }
 0x54b   :  { %v4606_v61 = vpack.c.bf16 %v2638_v26, %v2637_v54  ;;  %v3553_v54 = vld [vmem:[%s5775_s5 + $0x20] sm:$0xff]  ;;  %v3556_v26 = vld [vmem:[%s5775_s5 + $0x38] sm:$0xff] }
 0x54c   :  { %v2613_v43 = vadd.f32 %v2609_v15, %v2456_v40  ;;  %v3310_v15 = vld [vmem:[%s5770_s14 + $0x50] sm:$0xff] }
 0x54d   :  { %v4626_v17 = vpack.c.bf16 %v3311_v16, %v3310_v15 }
 0x54e   :  { %v2621_v45 = vadd.f32 %v3858_v42, %v2613_v43 }
 0x550   :  { %v2625_v50 = vmax.f32 %v2621_v45, 0.0  ;;  %v3550_v45 = vld [vmem:[%s5775_s5 + $0x8] sm:$0xff] }
 0x551   :  { %v4638_v49 = vpack.c.bf16 %v3550_v45, %v3549_v44 }
 0x552   :  { %v2631_v52 = vmul.f32 %v2629_v51, %v2625_v50  ;;  %v3551_v50 = vld [vmem:[%s5775_s5 + $0x10] sm:$0xff]  ;;  %v3552_v51 = vld [vmem:[%s5775_s5 + $0x18] sm:$0xff] }
 0x554   :  { %2632 = vst [vmem:[#allocation7] sm:$0xff] %v2631_v52  ;;  %4371 = vmatpush3.msra.mxu0 %v2631_v52  ;;  %v4641_v52 = vpack.c.bf16 %v3552_v51, %v3551_v50 }
 0x555   :  { %v4313_v59 = vpop.f32.mrb[18].mxu0  ;;  %4373 = vmatmul.mubr.msk.f32.vlgmr.msra.gmra.mrb[22].mxu0 %vm270_vm10, %v3882_v55  ;;  %4610 = vmatprep.subr.bf16.mxu0 %v4951_v53 }
 0x556   :  { %v2819_v60 = vpop.f32.mrb[19].mxu0  ;;  %4612 = vmatpush3.bf16.msra.mxu0 %v4611_v56  ;;  %4407 = vmatprep.mubr.msk.f32.mxu0 %vm4952_vm0, %v4950_v22  ;;  %v3555_v56 = vld [vmem:[%s5775_s5 + $0x30] sm:$0xff] }
 0x557   :  { %4346 = vmatprep.mubr.f32.mxu1 %v2819_v60  ;;  %4613 = vmatprep.subr.bf16.mxu0 %v4951_v53  ;;  %v4647_v57 = vpack.c.bf16 %v3556_v26, %v3555_v56 }
 0x558   :  { %4347 = vmatmul.mubr.f32.vlgmr.msra.gmra.mrb[18].mxu1 %v4313_v59  ;;  %v3558_v59 = vld [vmem:[%s5775_s5 + $0x48] sm:$0xff] }
 0x559   :  { %4605 = vmatpush3.bf16.msra.mxu1 %v4602_v39  ;;  %v4364_v9 = vpop.f32.mrb[20].mxu0  ;;  %4357 = vmatprep.mubr.msk.f32.mxu1 %vm525_vm1, %v4774_v1  ;;  %v4650_v60 = vpack.c.bf16 %v3558_v59, %v3557_v58 }
 0x55a   :  { %v3086_v2 = vpop.f32.mrb[21].mxu0  ;;  %4607 = vmatprep.subr.bf16.mxu1 %v4606_v61  ;;  %4615 = vmatpush3.bf16.msra.mxu0 %v4614_v62  ;;  %v3560_v62 = vld [vmem:[%s5775_s5 + $0x58] sm:$0xff] }
 0x55b   :  { %4616 = vmatprep.subr.bf16.mxu0 %v4951_v53 }
 0x55d   :  { %4609 = vmatpush3.bf16.msra.mxu1 %v4606_v61  ;;  %v3559_v61 = vld [vmem:[%s5775_s5 + $0x50] sm:$0xff] }
 0x55e   :  { %4365 = vmatprep.subr.mxu1 %v3095_v4  ;;  %4618 = vmatpush3.bf16.msra.mxu0 %v4617_v3  ;;  %v4653_v63 = vpack.c.bf16 %v3560_v62, %v3559_v61  ;;  %v3564_v3 = vld [vmem:[%s5775_s5 + $0x78] sm:$0xff] }
 0x55f   :  { %4619 = vmatprep.subr.bf16.mxu0 %v4951_v53 }
 0x560   :  { %4358 = vmatmul.mubr.msk.f32.vlgmr.msra.gmra.mrb[18].mxu1 %vm525_vm1, %v4775_v13 }
 0x561   :  { %4366 = vmatpush3.msra.mxu1 %v3095_v4  ;;  %4367 = vmatprep.mubr.msk.f32.mxu1 %vm270_vm10, %v3086_v2  ;;  %v3563_v2 = vld [vmem:[%s5775_s5 + $0x70] sm:$0xff] }
 0x562   :  { %4621 = vmatpush3.bf16.msra.mxu0 %v4620_v7  ;;  %4410 = vmatprep.subr.mxu1 %v4950_v22  ;;  %v4659_v4 = vpack.c.bf16 %v3564_v3, %v3563_v2 }
 0x563   :  { %4622 = vmatprep.subr.bf16.mxu0 %v4951_v53 }
 0x566   :  { %4624 = vmatpush3.bf16.msra.mxu0 %v4623_v14 }
 0x567   :  { %4625 = vmatprep.subr.bf16.mxu0 %v4951_v53 }
 0x568   :  { %4368 = vmatmul.mubr.msk.f32.vlgmr.msra.gmra.mrb[18].mxu1 %vm270_vm10, %v4364_v9  ;;  %v3562_v9 = vld [vmem:[%s5775_s5 + $0x68] sm:$0xff] }
 0x569   :  { %4412 = vmatprep.mubr.msk.f32.mxu1 %vm4952_vm0, %v4950_v22  ;;  %4411 = vmatpush3.msra.mxu1 %v3210_v27  ;;  %v4656_v1 = vpack.c.bf16 %v3562_v9, %v3561_v0 }
 0x56a   :  { %4627 = vmatpush3.bf16.msra.mxu0 %v4626_v17  ;;  %4637 = vmatprep.subr.bf16.mxu1 %v4951_v53 }
 0x56b   :  { %4628 = vmatprep.subr.bf16.mxu0 %v4951_v53 }
 0x56c   :  { %4413 = vmatmul.mubr.msk.f32.vlgmr.msra.gmra.mrb[20].mxu1 %vm270_vm10, %v4776_v28  ;;  %vm3466_vm10 = vcmp.eq.s32.totalorder %v3885_v10, %v5472_v20 }
 0x56d   :  { %4454 = vmatprep.mubr.msk.f32.mxu1 %vm4952_vm0, %v4950_v22  ;;  %v3886_v43 = vsel %vm3466_vm10, 1.0, %v4950_v22  ;;  %4639 = vmatpush3.bf16.msra.mxu1 %v4638_v49 }
 0x56e   :  { %4630 = vmatpush3.bf16.msra.mxu0 %v4629_v21  ;;  %4640 = vmatprep.subr.bf16.mxu1 %v4951_v53 }
 0x56f   :  { %4631 = vmatprep.subr.bf16.mxu0 %v4951_v53 }
 0x571   :  { %4642 = vmatpush3.bf16.msra.mxu1 %v4641_v52 }
 0x572   :  { %4633 = vmatpush3.bf16.msra.mxu0 %v4632_v25  ;;  %4643 = vmatprep.subr.bf16.mxu1 %v4951_v53 }
 0x573   :  { %4634 = vmatprep.subr.bf16.mxu0 %v4951_v53 }
 0x628   :  { %v3289_v38 = vpop.f32.mrb[22].mxu0 }
 0x629   :  { %v3299_v30 = vmul.f32 %v3297_v29, %v3289_v38  ;;  %v4374_v47 = vpop.f32.mrb[23].mxu0 }
 0x62b   :  { %4408 = vmatmul.mubr.f32.vlgmr.msra.gmra.mrb[24].mxu0 %v3299_v30 }
 0x62c   :  { %4419 = vmatprep.mubr.msk.f32.mxu0 %vm4952_vm0, %v4950_v22  ;;  %v3554_v22 = vld [vmem:[%s5775_s5 + $0x28] sm:$0xff] }
 0x62d   :  { %v4644_v55 = vpack.c.bf16 %v3554_v22, %v3553_v54 }
 0x62f   :  { %4645 = vmatpush3.bf16.msra.mxu1 %v4644_v55 }
 0x630   :  { %4646 = vmatprep.subr.bf16.mxu1 %v4951_v53 }
 0x633   :  { %4648 = vmatpush3.bf16.msra.mxu1 %v4647_v57 }
 0x634   :  { %4649 = vmatprep.subr.bf16.mxu1 %v4951_v53 }
 0x637   :  { %4651 = vmatpush3.bf16.msra.mxu1 %v4650_v60 }
 0x638   :  { %4652 = vmatprep.subr.bf16.mxu1 %v4951_v53 }
 0x63b   :  { %v4369_v32 = vpop.f32.mrb[18].mxu1  ;;  %4654 = vmatpush3.bf16.msra.mxu1 %v4653_v63 }
 0x63c   :  { %v3187_v11 = vadd.f32 %v4369_v32, %v3878_v46  ;;  %v3168_v33 = vpop.f32.mrb[19].mxu1  ;;  %4655 = vmatprep.subr.bf16.mxu1 %v4951_v53 }
 0x63d   :  { %v3186_v34 = vadd.f32 %v3878_v46, %v3168_v33 }
 0x63e   :  { %v3195_v36 = vmax.f32 %v3187_v11, 0.0 }
 0x63f   :  { %v3194_v39 = vmax.f32 %v3186_v34, 0.0  ;;  %v3455_v48 = vpop.f32.mrb[20].mxu1  ;;  %4657 = vmatpush3.bf16.msra.mxu1 %v4656_v1 }
 0x640   :  { %v3207_v40 = vmul.f32 %v4773_v35, %v3195_v36  ;;  %v4414_v20 = vpop.f32.mrb[21].mxu1  ;;  %4658 = vmatprep.subr.bf16.mxu1 %v4951_v53 }
 0x641   :  { %v3206_v41 = vmul.f32 %v4772_v37, %v3194_v39 }
 0x642   :  { %3209 = vst [vmem:[#allocation9 + $0x8] sm:$0xff] %v3207_v40 }
 0x643   :  { %3208 = vst [vmem:[#allocation9] sm:$0xff] %v3206_v41  ;;  %v4635_v42 = vpack.c.bf16 %v3207_v40, %v3206_v41  ;;  %4660 = vmatpush3.bf16.msra.mxu1 %v4659_v4 }
 0x645   :  { %4636 = vmatpush3.bf16.msra.mxu0 %v4635_v42 }
 0x648   :  { %4420 = vmatmul.mubr.msk.f32.vlgmr.msra.gmra.mrb[26].mxu0 %vm354_vm9, %v3886_v43 }
 0x6fe   :  { %v3382_v5 = vpop.f32.mrb[24].mxu0 }
 0x6ff   :  { %v5636_v6 = vadd.f32 %v3455_v48, %v3382_v5  ;;  %v4409_v7 = vpop.f32.mrb[25].mxu0 }
 0x71b   :  { %v3538_v12 = vpop.f32.mrb[26].mxu0 }
 0x71c   :  { %v3548_v13 = vmul.f32 %v3546_v8, %v3538_v12  ;;  %v4421_v14 = vpop.f32.mrb[27].mxu0 }
 0x71e   :  { %4455 = vmatmul.mubr.f32.vlgmr.msra.gmra.mrb[22].mxu1 %v3548_v13 }
 0x71f   :  { %4788 = shalt.err (!%p4785_p4)
}
 0x720   :  { %s5776_s1 = sld [smem:[#allocation51_spill]] }
 0x726   :  { %s4789_s2 = scalar_lea.hbm %s5776_s1, 256 }
 0x727   :  { %p4790_p5 = scmp.ne.s32.totalorder %s5776_s1, %s4789_s2  ;;  %p4793_p6 = scmp.lt.u32.totalorder %s4789_s2, %s5776_s1 }
 0x729   :  { %p4795_p7 = pnand %p4793_p6, %p4790_p5 }
 0x72b   :  { %4798 = shalt.err (!%p4795_p7)
}
 0x72c   :  { %s4955_s7 = smov 128   ;;  %s4956_s10 = smov 8  }
 0x72d   :  { %3669 = dma.vmem_to_hbm [thread:$0]  %s3664_s12, 256, %s5776_s1, [#allocation5], %s4955_s7, %s4955_s7, %s4956_s10  }
 0x72e   :  { %s4799_s11 = scalar_lea.vmem %s3689_s4, 128  ;;  %p4804_p9 = scmp.lt.s32.totalorder %s3689_s4, %s3689_s4 }
 0x72f   :  { %p4800_p8 = scmp.ne.s32.totalorder %s3689_s4, %s4799_s11  ;;  %p4805_p10 = scmp.lt.s32.totalorder %s4799_s11, %s4799_s11 }
 0x731   :  { %p4806_p11 = por %p4805_p10, %p4804_p9 }
 0x733   :  { %p4807_p12 = pnand %p4806_p11, %p4800_p8 }
 0x735   :  { %4810 = shalt.err (!%p4807_p12)
}
 0x736   :  { %s4811_s15 = scalar_lea.hbm %s5238_s3, 128 }
 0x737   :  { %p4812_p13 = scmp.ne.s32.totalorder %s5238_s3, %s4811_s15  ;;  %p4815_p0 = scmp.lt.u32.totalorder %s4811_s15, %s5238_s3 }
 0x739   :  { %p4817_p1 = pnand %p4815_p0, %p4812_p13 }
 0x73b   :  { %4820 = shalt.err (!%p4817_p1)
}
 0x73c   :  { %3691 = dma.vmem_to_hbm [thread:$0]  %s3689_s4, 128, %s5238_s3, [#allocation8]  }
 0x73d   :  { %s4957_s16 = smov [#allocation2]   ;;  %s4958_s22 = smov [#allocation6]  }
 0x73e   :  { %s3651_s18 = sshll.u32 %s4957_s16, 4  ;;  %s3675_s23 = sshll.u32 %s4958_s22, 4  ;;  %s3652_s18 = int_to_ptr.vmem [resolvable:$true] %s3651_s18  ;;  %s5649_s23 = int_to_ptr.vmem [resolvable:$true] %s3675_s23 }
 0x73f   :  { %s4821_s26 = scalar_lea.vmem %s3652_s18, 256  ;;  %p4826_p3 = scmp.lt.s32.totalorder %s3652_s18, %s3652_s18 }
 0x740   :  { %p4822_p2 = scmp.ne.s32.totalorder %s3652_s18, %s4821_s26  ;;  %p4827_p4 = scmp.lt.s32.totalorder %s4821_s26, %s4821_s26 }
 0x742   :  { %p4828_p5 = por %p4827_p4, %p4826_p3 }
 0x744   :  { %p4829_p6 = pnand %p4828_p5, %p4822_p2 }
 0x746   :  { %4832 = shalt.err (!%p4829_p6)
}
 0x747   :  { %s5777_s0 = sld [smem:[#allocation50_spill]] }
 0x74d   :  { %s4833_s9 = scalar_lea.hbm %s5777_s0, 256 }
 0x74e   :  { %p4834_p7 = scmp.ne.s32.totalorder %s5777_s0, %s4833_s9  ;;  %p4837_p8 = scmp.lt.u32.totalorder %s4833_s9, %s5777_s0 }
 0x750   :  { %p4839_p9 = pnand %p4837_p8, %p4834_p7 }
 0x752   :  { %4842 = shalt.err (!%p4839_p9)
}
 0x753   :  { %3657 = dma.vmem_to_hbm [thread:$0]  %s3652_s18, 256, %s5777_s0, [#allocation3], %s4955_s7, %s4955_s7, %s4956_s10  }
 0x754   :  { %s4843_s3 = scalar_lea.vmem %s5649_s23, 256  ;;  %p4848_p11 = scmp.lt.s32.totalorder %s5649_s23, %s5649_s23 }
 0x755   :  { %p4844_p10 = scmp.ne.s32.totalorder %s5649_s23, %s4843_s3  ;;  %p4849_p12 = scmp.lt.s32.totalorder %s4843_s3, %s4843_s3 }
 0x757   :  { %p4850_p13 = por %p4849_p12, %p4848_p11 }
 0x759   :  { %p4851_p0 = pnand %p4850_p13, %p4844_p10 }
 0x75b   :  { %4854 = shalt.err (!%p4851_p0)
}
 0x75c   :  { %s4855_s13 = scalar_lea.hbm %s5233_s25, 256 }
 0x75d   :  { %p4856_p1 = scmp.ne.s32.totalorder %s5233_s25, %s4855_s13  ;;  %p4859_p2 = scmp.lt.u32.totalorder %s4855_s13, %s5233_s25 }
 0x75f   :  { %p4861_p3 = pnand %p4859_p2, %p4856_p1 }
 0x761   :  { %4864 = shalt.err (!%p4861_p3)
}
 0x762   :  { %3681 = dma.vmem_to_hbm [thread:$0]  %s5649_s23, 256, %s5233_s25, [#allocation5], %s4955_s7, %s4955_s7, %s4956_s10  }
 0x763   :  { %s4959_s17 = smov [#allocation9]  }
 0x764   :  { %s3697_s21 = sshll.u32 %s4959_s17, 4  ;;  %s3698_s21 = int_to_ptr.vmem [resolvable:$true] %s3697_s21 }
 0x765   :  { %s4865_s14 = scalar_lea.vmem %s3698_s21, 256  ;;  %p4870_p5 = scmp.lt.s32.totalorder %s3698_s21, %s3698_s21 }
 0x766   :  { %p4866_p4 = scmp.ne.s32.totalorder %s3698_s21, %s4865_s14  ;;  %p4871_p6 = scmp.lt.s32.totalorder %s4865_s14, %s4865_s14 }
 0x768   :  { %p4872_p7 = por %p4871_p6, %p4870_p5 }
 0x76a   :  { %p4873_p8 = pnand %p4872_p7, %p4866_p4 }
 0x76c   :  { %4876 = shalt.err (!%p4873_p8)
}
 0x76d   :  { %s4877_s19 = scalar_lea.hbm %s5243_s27, 256 }
 0x76e   :  { %p4878_p9 = scmp.ne.s32.totalorder %s5243_s27, %s4877_s19  ;;  %p4881_p10 = scmp.lt.u32.totalorder %s4877_s19, %s5243_s27 }
 0x770   :  { %p4883_p11 = pnand %p4881_p10, %p4878_p9 }
 0x772   :  { %4886 = shalt.err (!%p4883_p11)
}
 0x773   :  { %s5778_s25 = sld [smem:[#allocation49_spill]] }
 0x774   :  { %3703 = dma.vmem_to_hbm [thread:$0]  %s3698_s21, 256, %s5243_s27, [#allocation8], %s4955_s7, %s4955_s7, %s4956_s10  }
 0x779   :  { %v3888_v15 = vld [vmem:[%s5778_s25] ss:$0 sm:$0xff] }
 0x7f1   :  { %v3631_v53 = vpop.f32.mrb[22].mxu1 }
 0x7f2   :  { %v3635_v16 = vadd.f32 %v3631_v53, %v5636_v6  ;;  %v4456_v17 = vpop.f32.mrb[23].mxu1 }
 0x7f4   :  { %v3643_v18 = vadd.f32 %v3888_v15, %v3635_v16 }
 0x7f6   :  { %v3644_v19 = vmax.f32 %v3643_v18, 0.0 }
 0x7f8   :  { %3645 = vst [vmem:[%s5248_s8] sm:$0xff] %v3644_v19 }
 0x7f9   :  { %4887 = dma.done.wait [#allocation3], 256  }
 0x7fa   :  { %4888 = vsyncadd [#allocation3], 4294967040 }
 0x7fb   :  { %4889 = dma.done.wait [#allocation5], 512  }
 0x7fc   :  { %4890 = vsyncadd [#allocation5], 4294966784 }
 0x7fd   :  { %4891 = dma.done.wait [#allocation8], 384  }
 0x7fe   :  { %4892 = vsyncadd [#allocation8], 4294966912 }
 0x7ff   :  { %3723 = vsyncpa [#allocation3], 1 }
 0x800   :  { %3724 = vsyncpa [#allocation5], 1 }
 0x801   :  { %3725 = vsyncpa [#allocation8], 1 }

</bundles_post_ra>
